<compile_context>
chip_gen: v5e
topology: v5e:2x2
jax: 0.10.0
libtpu: 0.0.40
codegen_flags: <defaults>
</compile_context>

<pallas_src>
import jax
import jax.numpy as jnp
from jax.experimental import pallas as pl
from jax.experimental.pallas import tpu as pltpu


def _vfe_kernel(x_ref, w_ref, shift_ref, pw_ref, agg_ref):
    # x_ref:     (KB, T, C_in)   f32, KB voxels per grid step
    # w_ref:     (C_in, units)   bf16, linear weight pre-transposed, BN scale folded in
    # shift_ref: (1, units)      f32, folded BN shift = beta - mean * scale
    # pw_ref:    (KB, T, units)  out_dtype, pointwise = relu(BN(linear(x)))
    # agg_ref:   (KB, 1, units)  out_dtype, max over T (keepdim)
    KB, T, C_in = x_ref.shape
    units = w_ref.shape[1]

    # In-kernel bf16 cast (VPU has slack) + flatten voxels*points into the
    # matmul M dimension (free relayout when T is a multiple of the sublane tile).
    x = x_ref[...].astype(jnp.bfloat16).reshape(KB * T, C_in)
    y = jnp.dot(x, w_ref[...], preferred_element_type=jnp.float32)   # (KB*T, units) f32
    y = y + shift_ref[...]                                           # BN shift (scale folded into w)
    pw = jnp.maximum(y, 0.0).reshape(KB, T, units)                   # ReLU, f32

    pw_ref[...] = pw.astype(pw_ref.dtype)
    # NOTE: the max includes intra-voxel zero-padded points, exactly like the
    # plain PyTorch VFELayer (masked-VFE variants differ).
    agg_ref[...] = jnp.max(pw, axis=1, keepdims=True).astype(agg_ref.dtype)


def _vmem_limit_bytes():
    # Safe on every generation: half of per-core VMEM, capped at 32 MiB
    # (== v6e/v7x scoped default, raises v5e's 16 MiB default).
    try:
        cap = int(pltpu.get_tpu_info().vmem_capacity_bytes)
    except Exception:
        cap = 64 * 1024 * 1024  # most conservative (v7x per-core)
    return min(cap // 2, 32 * 1024 * 1024)


def vfe_layer_fused(inputs, weight, gamma, beta, running_mean, running_var,
                    eps=1e-3, block_k=4096, out_dtype=jnp.bfloat16):
    """Pallas VFE layer, fused-consumer form.

    inputs: (K, T, C_in) float32.  weight: (units, C_in) (PyTorch Linear layout).
    Returns (pointwise, aggregated):
      pointwise : (K, T, units)  out_dtype
      aggregated: (K, 1, units)  out_dtype
    Downstream layers should consume these two tensors directly; materializing
    the T-times-tiled concatenation (see `vfe_layer`) re-adds the redundant HBM
    traffic this kernel avoids.  Pass out_dtype=jnp.float32 for exact module dtype.
    """
    K, T, C_in = inputs.shape
    units = int(weight.shape[0])

    # Fold eval-mode BatchNorm: scale into the weight (in f32, before the bf16
    # cast), shift kept as a per-channel add inside the kernel.
    scale = gamma / jnp.sqrt(running_var + eps)                              # (units,) f32
    shift2d = (beta - running_mean * scale).reshape(1, units).astype(jnp.float32)
    w_folded = (weight * scale[:, None]).T.astype(jnp.bfloat16)              # (C_in, units)

    # --- Voxel batch per grid step, derived from the VMEM budget -------------
    out_bytes = jnp.dtype(out_dtype).itemsize
    in_bytes = jnp.dtype(inputs.dtype).itemsize
    # Double-buffered bytes per voxel: input block + both output blocks.
    per_voxel = 2 * (T * C_in * in_bytes + T * units * out_bytes + units * out_bytes)
    vmem_limit = _vmem_limit_bytes()
    block_budget = (vmem_limit * 3) // 4          # leave headroom for resident params/scratch

    kb = block_budget // per_voxel
    kb = min(kb, block_k)
    # Keep >= ~8 grid steps when K is large enough (pipelining; both v7x cores).
    kb = min(kb, max(16, (pl.cdiv(K, 8) // 16) * 16))
    kb = max(16, (kb // 16) * 16)                 # multiple of 16: bf16 sublane tile
    KB = int(kb)
    num_blocks = pl.cdiv(K, KB)                   # ragged last block handled by Pallas clipping

    grid_spec = pl.GridSpec(
        grid=(num_blocks,),
        in_specs=[
            pl.BlockSpec((KB, T, C_in), lambda k: (k, 0, 0)),
            pl.BlockSpec((C_in, units), lambda k: (0, 0)),   # VMEM-resident
            pl.BlockSpec((1, units), lambda k: (0, 0)),      # VMEM-resident
        ],
        out_specs=[
            pl.BlockSpec((KB, T, units), lambda k: (k, 0, 0)),
            pl.BlockSpec((KB, 1, units), lambda k: (k, 0, 0)),
        ],
    )

    pointwise, aggregated = pl.pallas_call(
        _vfe_kernel,
        out_shape=(
            jax.ShapeDtypeStruct((K, T, units), out_dtype),
            jax.ShapeDtypeStruct((K, 1, units), out_dtype),
        ),
        grid_spec=grid_spec,
        compiler_params=pltpu.CompilerParams(
            dimension_semantics=("parallel",),
            vmem_limit_bytes=vmem_limit,
        ),
    )(inputs, w_folded, shift2d)

    return pointwise, aggregated


def vfe_layer(inputs, weight, gamma, beta, running_mean, running_var,
              eps=1e-3, block_k=4096, out_dtype=jnp.bfloat16):
    """Exact module output: concat([pointwise, tile(aggregated, T)], -1).

    The tile + concat happen in plain JAX; prefer `vfe_layer_fused` when the
    consumer can take (pointwise, aggregated) directly.
    """
    pointwise, aggregated = vfe_layer_fused(
        inputs, weight, gamma, beta, running_mean, running_var,
        eps=eps, block_k=block_k, out_dtype=out_dtype)
    repeated = jnp.broadcast_to(aggregated, pointwise.shape)
    return jnp.concatenate([pointwise, repeated], axis=-1)


def _reference(inputs, weight, gamma, beta, running_mean, running_var, eps=1e-3):
    # Faithful f32 eval-mode forward of the PyTorch module.
    x = jnp.einsum("ktc,uc->ktu", inputs, weight)
    x = (x - running_mean) / jnp.sqrt(running_var + eps) * gamma + beta
    pointwise = jnp.maximum(x, 0.0)
    aggregated = jnp.max(pointwise, axis=1, keepdims=True)
    repeated = jnp.broadcast_to(aggregated, pointwise.shape)
    return jnp.concatenate([pointwise, repeated], axis=2)


if __name__ == "__main__":
    # Small, module-consistent shapes:
    #   K voxels (deliberately NOT a multiple of the K-block, to exercise the
    #   ragged last block), T points per voxel, in_channels, out_channels.
    K, T, C_in, C_out = 200, 16, 16, 64
    units = C_out // 2

    key = jax.random.PRNGKey(0)
    k_in, k_w, k_g, k_b, k_m, k_v = jax.random.split(key, 6)

    inputs = jax.random.normal(k_in, (K, T, C_in), dtype=jnp.float32)
    weight = jax.random.normal(k_w, (units, C_in), dtype=jnp.float32) * 0.1
    gamma = 1.0 + 0.1 * jax.random.normal(k_g, (units,), dtype=jnp.float32)
    beta = 0.1 * jax.random.normal(k_b, (units,), dtype=jnp.float32)
    running_mean = 0.05 * jax.random.normal(k_m, (units,), dtype=jnp.float32)
    running_var = jnp.abs(1.0 + 0.1 * jax.random.normal(k_v, (units,), dtype=jnp.float32))

    out = vfe_layer(inputs, weight, gamma, beta, running_mean, running_var)
    out = jax.block_until_ready(out)

    ref = _reference(inputs, weight, gamma, beta, running_mean, running_var)
    assert out.shape == (K, T, C_out), out.shape
    # Tolerance accounts for bf16 matmul operands and the bf16 output dtype
    # (kernel math itself is f32: MXU accumulation, BN shift, ReLU, max).
    assert jnp.allclose(out.astype(jnp.float32), ref, atol=5e-2, rtol=5e-2), (
        "mismatch vs reference: max abs err = "
        f"{float(jnp.max(jnp.abs(out.astype(jnp.float32) - ref)))}")

    print("KERNEL_OK")
</pallas_src>

<mosaic_0001>
module attributes {stable_mosaic.version = 11 : i64} {
  func.func @_vfe_kernel(%arg0: i32, %arg1: memref<16x16x16xf32, #tpu.memory_space<vmem>>, %arg2: memref<16x32xbf16, #tpu.memory_space<vmem>>, %arg3: memref<1x32xf32, #tpu.memory_space<vmem>>, %arg4: memref<16x16x32xbf16, #tpu.memory_space<vmem>>, %arg5: memref<16x1x32xbf16, #tpu.memory_space<vmem>>) attributes {dimension_semantics = [#tpu.dimension_semantics<parallel>], iteration_bounds = array<i64: 13>, scalar_prefetch = 0 : i64, scratch_operands = 0 : i64, tpu.core_type = #tpu.core_type<tc>, window_params = [{transform_indices = @transform_0, window_bounds = array<i64: 16, 16, 16>}, {pipeline_mode = #tpu.pipeline_mode<synchronous>, transform_indices = @transform_1, window_bounds = array<i64: 16, 32>}, {pipeline_mode = #tpu.pipeline_mode<synchronous>, transform_indices = @transform_2, window_bounds = array<i64: 1, 32>}, {transform_indices = @transform_3, window_bounds = array<i64: 16, 16, 32>}, {transform_indices = @transform_4, window_bounds = array<i64: 16, 1, 32>}]} {
    %c0 = arith.constant 0 : index
    %c0_0 = arith.constant 0 : index
    %c0_1 = arith.constant 0 : index
    %0 = vector.load %arg1[%c0, %c0_0, %c0_1] : memref<16x16x16xf32, #tpu.memory_space<vmem>>, vector<16x16x16xf32>
    %1 = arith.truncf %0 : vector<16x16x16xf32> to vector<16x16x16xbf16>
    %2 = vector.shape_cast %1 : vector<16x16x16xbf16> to vector<256x16xbf16>
    %c0_2 = arith.constant 0 : index
    %c0_3 = arith.constant 0 : index
    %3 = vector.load %arg2[%c0_2, %c0_3] : memref<16x32xbf16, #tpu.memory_space<vmem>>, vector<16x32xbf16>
    %cst = arith.constant dense<0.000000e+00> : vector<256x32xf32>
    %4 = tpu.matmul %2, %3, %cst {dimension_numbers = #tpu.dot_dimension_numbers<[1], [0], [0], [1], [0, 0, 1, 1], [], []>} : vector<256x16xbf16>, vector<16x32xbf16>, vector<256x32xf32> -> vector<256x32xf32>
    %c0_4 = arith.constant 0 : index
    %c0_5 = arith.constant 0 : index
    %5 = vector.load %arg3[%c0_4, %c0_5] : memref<1x32xf32, #tpu.memory_space<vmem>>, vector<1x32xf32>
    %6 = vector.broadcast %5 : vector<1x32xf32> to vector<256x32xf32>
    %7 = arith.addf %4, %6 : vector<256x32xf32>
    %cst_6 = arith.constant 0.000000e+00 : f32
    %8 = vector.broadcast %cst_6 : f32 to vector<256x32xf32>
    %9 = arith.maximumf %7, %8 : vector<256x32xf32>
    %10 = vector.shape_cast %9 : vector<256x32xf32> to vector<16x16x32xf32>
    %11 = arith.truncf %10 : vector<16x16x32xf32> to vector<16x16x32xbf16>
    %c0_7 = arith.constant 0 : index
    %c0_8 = arith.constant 0 : index
    %c0_9 = arith.constant 0 : index
    %12 = vector.load %arg4[%c0_7, %c0_8, %c0_9] : memref<16x16x32xbf16, #tpu.memory_space<vmem>>, vector<16x16x32xbf16>
    tpu.vector_store %arg4[%c0_7, %c0_8, %c0_9], %11 {strides = array<i32>} : memref<16x16x32xbf16, #tpu.memory_space<vmem>>, vector<16x16x32xbf16>,
    %cst_10 = arith.constant dense<0xFF800000> : vector<16x32xf32>
    %13 = vector.multi_reduction <maximumf>, %10, %cst_10 [1] : vector<16x16x32xf32> to vector<16x32xf32>
    %14 = vector.shape_cast %13 : vector<16x32xf32> to vector<16x1x32xf32>
    %15 = arith.truncf %14 : vector<16x1x32xf32> to vector<16x1x32xbf16>
    %c0_11 = arith.constant 0 : index
    %c0_12 = arith.constant 0 : index
    %c0_13 = arith.constant 0 : index
    %16 = vector.load %arg5[%c0_11, %c0_12, %c0_13] : memref<16x1x32xbf16, #tpu.memory_space<vmem>>, vector<16x1x32xbf16>
    tpu.vector_store %arg5[%c0_11, %c0_12, %c0_13], %15 {strides = array<i32>} : memref<16x1x32xbf16, #tpu.memory_space<vmem>>, vector<16x1x32xbf16>,
    return
  }
  func.func @transform_0(%arg0: i32) -> (i32, i32, i32) {
    %c0_i32 = arith.constant 0 : i32
    %c0_i32_0 = arith.constant 0 : i32
    %c0_i32_1 = arith.constant 0 : i32
    return %arg0, %c0_i32, %c0_i32_0 : i32, i32, i32
  }
  func.func @transform_1(%arg0: i32) -> (i32, i32) {
    %c0_i32 = arith.constant 0 : i32
    %c0_i32_0 = arith.constant 0 : i32
    %c0_i32_1 = arith.constant 0 : i32
    return %c0_i32, %c0_i32_0 : i32, i32
  }
  func.func @transform_2(%arg0: i32) -> (i32, i32) {
    %c0_i32 = arith.constant 0 : i32
    %c0_i32_0 = arith.constant 0 : i32
    %c0_i32_1 = arith.constant 0 : i32
    return %c0_i32, %c0_i32_0 : i32, i32
  }
  func.func @transform_3(%arg0: i32) -> (i32, i32, i32) {
    %c0_i32 = arith.constant 0 : i32
    %c0_i32_0 = arith.constant 0 : i32
    %c0_i32_1 = arith.constant 0 : i32
    return %arg0, %c0_i32, %c0_i32_0 : i32, i32, i32
  }
  func.func @transform_4(%arg0: i32) -> (i32, i32, i32) {
    %c0_i32 = arith.constant 0 : i32
    %c0_i32_0 = arith.constant 0 : i32
    %c0_i32_1 = arith.constant 0 : i32
    return %arg0, %c0_i32, %c0_i32_0 : i32, i32, i32
  }
}

</mosaic_0001>

<bundles_post_ra>
// kernel: tpu_custom_call.1
= control target key start
LH: loop header
LB: loop body
LE: loop exit
PB: predicated region body
PF: predicated region fallthrough
CT: control target
= control target key end

     0   :  { %s2126_s15 = smov 0   ;;  %s2128_s16 = smov 0   ;;  %s2861_s0 = inlined_call_operand.vmem [shape: f32[200,16,16], index: 0, kind: input, shape index: {}]   ;;  %s2862_s1 = inlined_call_operand.vmem [shape: bf16[16,32], index: 1, kind: input, shape index: {}]   ;;  %s2863_s2 = inlined_call_operand.vmem [shape: f32[1,32], index: 2, kind: input, shape index: {}]   ;;  %s2864_s3 = inlined_call_operand.vmem [shape: bf16[200,16,32], index: 3, kind: output, shape index: {0}]   ;;  %s2865_s4 = inlined_call_operand.vmem [shape: bf16[200,1,32], index: 4, kind: output, shape index: {1}]  }
   0x1   :  { %s2130_s17 = smov 0  }
   0x2 LB: > { %s2139_s18 = sadd.s32 4294967295, %s2001_s17   ;;  %s2141_s19 = sadd.s32 1, %s2001_s17   ;;  %s2001_s17 = sphi %s2130_s17, %s2886_s17   ;;  %s1997_s16 = sphi %s2128_s16, %s2885_s16   ;;  %s1993_s15 = sphi %s2126_s15, %s2884_s15  }
   0x3   : > { %s87_s20 = ssub.s32 %s2001_s17, %s2141_s19  ;;  %s90_s21 = sadd.s32 1, %s1997_s16 }
   0x4   : > { %p88_p0 = scmp.eq.s32.totalorder %s87_s20, 0  ;;  %p100_p1 = scmp.ne.s32.totalorder %s1997_s16, %s1993_s15 }
   0x5   : > { %p101_p2 = scmp.eq.s32.totalorder %s2139_s18, 12  ;;  %p1578_p3 = scmp.ge.s32.totalorder %s2001_s17, 1 }
   0x6   : > { %s2149_s22 = scalar_select %p88_p0, %s1997_s16, %s90_s21  }
   0x7   : > { %p2151_p4 = por %p101_p2, %p100_p1  ;;  %p177_p5 = scmp.lt.s32.totalorder %s2001_s17, 14 }
   0x9   : > { %p178_p6 = pnand %p1578_p3, %p177_p5 }
   0xa   : > { %s2159_s26 = sshll.u32 (!%p178_p6), %s2139_s18, 4  ;;  %s203_s8 = sand.u32 (!%p178_p6), 1, %s1993_s15  }
   0xb   : > { %181 = sbr.rel (%p178_p6) target bundleno = 459 (0x1cb), region = 32  ;;  %p218_p7 = scmp.lt.s32.totalorder (!%p178_p6), %s2159_s26, 199 }
   0xc   : > { %s1579_s9 = sshll.u32 (!%p178_p6), %s203_s8, 7  ;;  %s2256_s11 = sshll.u32 (!%p178_p6), %s203_s8, 4 }
   0xd   : > { %s2226_s10 = scalar_lea.vmem (!%p178_p6), [#allocation2], %s1579_s9   ;;  %s2280_s12 = scalar_lea.vmem (!%p178_p6), [#allocation3], %s2256_s11  }
  0x10   : > { %v1651_v0 = vld [vmem:[%s2862_s1] sm:$0xff]  ;;  %s219_s27 = scalar_select %p218_p7, %s2159_s26, 199  ;;  %vm396_vm0 = vcmask 130048   ;;  %vm598_vm1 = vcmask 257024   ;;  %vm631_vm2 = vcmask 261120   ;;  %vm792_vm3 = vcmask 253952  }
  0x11   : > { %452 = vmatpush.bf16.msra.mxu0 %v1651_v0  ;;  %1661 = vmatpush.bf16.msra.mxu1 %v1651_v0  ;;  %vm793_vm4 = vsmask.f32 256  ;;  %s855_s13 = ssub.s32 (%p2151_p4), 200, %s2159_s26  ;;  %s1654_s14 = sshll.u32 (%p2151_p4), %s2139_s18, 7 }
  0x12   : > { %1662 = vmatpush.bf16.msra.mxu2 %v1651_v0  ;;  %1663 = vmatpush.bf16.msra.mxu3 %v1651_v0  ;;  %s1650_s28 = sshll.u32 %s219_s27, 4  ;;  %vm2275_vm5 = vmand %vm792_vm3, %vm793_vm4  ;;  %p856_p8 = scmp.lt.s32.totalorder (%p2151_p4), %s855_s13, 16 }
  0x13   : > { %s2166_s5 = scalar_lea.vmem %s2861_s0, %s1650_s28  ;;  %s2438_s20 = scalar_lea.vmem (%p2151_p4), %s2864_s3, %s1654_s14  }
  0x14   : > { %v240_v1 = vld [vmem:[%s2166_s5] sm:$0xff]  ;;  %v241_v2 = vld [vmem:[%s2166_s5 + $0x8] sm:$0xff]  ;;  %v242_v29 = vld [vmem:[%s2166_s5 + $0x10] sm:$0xff] }
  0x15   : > { %v248_v3 = vld [vmem:[%s2166_s5 + $0x40] sm:$0xff]  ;;  %v272_v4 = vpack.c.bf16 %v240_v1, %v240_v1  ;;  %v273_v5 = vpack.c.bf16 %v241_v2, %v241_v2  ;;  %v249_v6 = vld [vmem:[%s2166_s5 + $0x48] sm:$0xff]  ;;  %v243_v30 = vld [vmem:[%s2166_s5 + $0x18] sm:$0xff]  ;;  %v274_v35 = vpack.c.bf16 %v242_v29, %v242_v29 }
  0x16   : > { %v280_v7 = vpack.c.bf16 %v248_v3, %v248_v3  ;;  %v256_v8 = vld [vmem:[%s2166_s5 + $0x80] sm:$0xff]  ;;  %v257_v9 = vld [vmem:[%s2166_s5 + $0x88] sm:$0xff]  ;;  %v281_v10 = vpack.c.bf16 %v249_v6, %v249_v6  ;;  %v250_v31 = vld [vmem:[%s2166_s5 + $0x50] sm:$0xff]  ;;  %v275_v36 = vpack.c.bf16 %v243_v30, %v243_v30 }
  0x17   : > { %v288_v11 = vpack.c.bf16 %v256_v8, %v256_v8  ;;  %v289_v12 = vpack.c.bf16 %v257_v9, %v257_v9  ;;  %v264_v13 = vld [vmem:[%s2166_s5 + $0xc0] sm:$0xff]  ;;  %v265_v14 = vld [vmem:[%s2166_s5 + $0xc8] sm:$0xff]  ;;  %v342_v15 = vunpack.c.l.b16 %v272_v4  ;;  %v343_v16 = vunpack.c.l.b16 %v273_v5  ;;  %v251_v32 = vld [vmem:[%s2166_s5 + $0x58] sm:$0xff] }
  0x18   : > { %v350_v17 = vunpack.c.l.b16 %v280_v7  ;;  %v296_v18 = vpack.c.bf16 %v264_v13, %v264_v13  ;;  %v351_v19 = vunpack.c.l.b16 %v281_v10  ;;  %v297_v22 = vpack.c.bf16 %v265_v14, %v265_v14  ;;  %v258_v33 = vld [vmem:[%s2166_s5 + $0x90] sm:$0xff]  ;;  %v259_v34 = vld [vmem:[%s2166_s5 + $0x98] sm:$0xff]  ;;  %v244_v57 = vld [vmem:[%s2166_s5 + $0x20] sm:$0xff] }
  0x19   : > { %v358_v20 = vunpack.c.l.b16 %v288_v11  ;;  %v359_v21 = vunpack.c.l.b16 %v289_v12  ;;  %v374_v23 = vpack.c.b16 %v343_v16, %v342_v15  ;;  %v266_v37 = vld [vmem:[%s2166_s5 + $0xd0] sm:$0xff]  ;;  %v267_v38 = vld [vmem:[%s2166_s5 + $0xd8] sm:$0xff]  ;;  %v282_v39 = vpack.c.bf16 %v250_v31, %v250_v31  ;;  %v245_v58 = vld [vmem:[%s2166_s5 + $0x28] sm:$0xff] }
  0x1a   : > { %v366_v24 = vunpack.c.l.b16 %v296_v18  ;;  %v378_v25 = vpack.c.b16 %v351_v19, %v350_v17  ;;  %v367_v27 = vunpack.c.l.b16 %v297_v22  ;;  %v283_v40 = vpack.c.bf16 %v251_v32, %v251_v32  ;;  %v252_v59 = vld [vmem:[%s2166_s5 + $0x60] sm:$0xff]  ;;  %v253_v60 = vld [vmem:[%s2166_s5 + $0x68] sm:$0xff]  ;;  %v247_v22 = vld [vmem:[%s2166_s5 + $0x38] sm:$0xff] }
  0x1b   : > { %v382_v26 = vpack.c.b16 %v359_v21, %v358_v20  ;;  %1588 = vmatmul.msk.bf16.vlgmr.msra.gmra.mxu0 %vm396_vm0, %v374_v23  ;;  %v290_v41 = vpack.c.bf16 %v258_v33, %v258_v33  ;;  %v291_v42 = vpack.c.bf16 %v259_v34, %v259_v34  ;;  %v298_v43 = vpack.c.bf16 %v266_v37, %v266_v37  ;;  %v260_v61 = vld [vmem:[%s2166_s5 + $0xa0] sm:$0xff]  ;;  %v261_v62 = vld [vmem:[%s2166_s5 + $0xa8] sm:$0xff]  ;;  %v246_v21 = vld [vmem:[%s2166_s5 + $0x30] sm:$0xff] }
  0x1c   : > { %1592 = vmatmul.msk.bf16.vlgmr.msra.gmra.mxu1 %vm396_vm0, %v378_v25  ;;  %v386_v28 = vpack.c.b16 %v367_v27, %v366_v24  ;;  %v299_v44 = vpack.c.bf16 %v267_v38, %v267_v38  ;;  %v344_v45 = vunpack.c.l.b16 %v274_v35  ;;  %v345_v46 = vunpack.c.l.b16 %v275_v36  ;;  %v268_v1 = vld [vmem:[%s2166_s5 + $0xe0] sm:$0xff]  ;;  %v269_v2 = vld [vmem:[%s2166_s5 + $0xe8] sm:$0xff]  ;;  %v254_v23 = vld [vmem:[%s2166_s5 + $0x70] sm:$0xff] }
  0x1d   : > { %1596 = vmatmul.msk.bf16.vlgmr.msra.gmra.mxu2 %vm396_vm0, %v382_v26  ;;  %v352_v47 = vunpack.c.l.b16 %v282_v39  ;;  %v353_v48 = vunpack.c.l.b16 %v283_v40  ;;  %v360_v49 = vunpack.c.l.b16 %v290_v41  ;;  %v361_v50 = vunpack.c.l.b16 %v291_v42  ;;  %v255_v24 = vld [vmem:[%s2166_s5 + $0x78] sm:$0xff]  ;;  %v262_v25 = vld [vmem:[%s2166_s5 + $0xb0] sm:$0xff] }
  0x1e   : > { %1600 = vmatmul.msk.bf16.vlgmr.msra.gmra.mxu3 %vm396_vm0, %v386_v28  ;;  %v368_v51 = vunpack.c.l.b16 %v298_v43  ;;  %v369_v52 = vunpack.c.l.b16 %v299_v44  ;;  %v375_v53 = vpack.c.b16 %v345_v46, %v344_v45  ;;  %v276_v63 = vpack.c.bf16 %v244_v57, %v244_v57  ;;  %v263_v26 = vld [vmem:[%s2166_s5 + $0xb8] sm:$0xff]  ;;  %v270_v29 = vld [vmem:[%s2166_s5 + $0xf0] sm:$0xff] }
  0x1f   : > { %v379_v54 = vpack.c.b16 %v353_v48, %v352_v47  ;;  %v383_v55 = vpack.c.b16 %v361_v50, %v360_v49  ;;  %v277_v0 = vpack.c.bf16 %v245_v58, %v245_v58  ;;  %v284_v3 = vpack.c.bf16 %v252_v59, %v252_v59  ;;  %v271_v30 = vld [vmem:[%s2166_s5 + $0xf8] sm:$0xff]  ;;  %v2219_v49 = vld [vmem:[%s2863_s2] ss:$0 sm:$0xff] }
  0x20   : > { %v387_v56 = vpack.c.b16 %v369_v52, %v368_v51  ;;  %v285_v4 = vpack.c.bf16 %v253_v60, %v253_v60  ;;  %v292_v5 = vpack.c.bf16 %v260_v61, %v260_v61  ;;  %v293_v6 = vpack.c.bf16 %v261_v62, %v261_v62 }
  0x21   : > { %v300_v7 = vpack.c.bf16 %v268_v1, %v268_v1  ;;  %v301_v8 = vpack.c.bf16 %v269_v2, %v269_v2  ;;  %v346_v9 = vunpack.c.l.b16 %v276_v63  ;;  %v347_v10 = vunpack.c.l.b16 %v277_v0 }
  0x22   : > { %v354_v11 = vunpack.c.l.b16 %v284_v3  ;;  %v355_v12 = vunpack.c.l.b16 %v285_v4  ;;  %v362_v13 = vunpack.c.l.b16 %v292_v5  ;;  %v363_v14 = vunpack.c.l.b16 %v293_v6 }
  0x23   : > { %v370_v15 = vunpack.c.l.b16 %v300_v7  ;;  %v371_v16 = vunpack.c.l.b16 %v301_v8  ;;  %v376_v17 = vpack.c.b16 %v347_v10, %v346_v9  ;;  %v278_v27 = vpack.c.bf16 %v246_v21, %v246_v21 }
  0x24   : > { %v380_v18 = vpack.c.b16 %v355_v12, %v354_v11  ;;  %v384_v19 = vpack.c.b16 %v363_v14, %v362_v13  ;;  %v279_v28 = vpack.c.bf16 %v247_v22, %v247_v22  ;;  %v286_v31 = vpack.c.bf16 %v254_v23, %v254_v23 }
  0x25   : > { %v388_v20 = vpack.c.b16 %v371_v16, %v370_v15  ;;  %v287_v32 = vpack.c.bf16 %v255_v24, %v255_v24  ;;  %v294_v33 = vpack.c.bf16 %v262_v25, %v262_v25  ;;  %v295_v34 = vpack.c.bf16 %v263_v26, %v263_v26 }
  0x26   : > { %v302_v35 = vpack.c.bf16 %v270_v29, %v270_v29  ;;  %v303_v36 = vpack.c.bf16 %v271_v30, %v271_v30  ;;  %v348_v37 = vunpack.c.l.b16 %v278_v27  ;;  %v349_v38 = vunpack.c.l.b16 %v279_v28 }
  0x27   : > { %v356_v39 = vunpack.c.l.b16 %v286_v31  ;;  %v357_v40 = vunpack.c.l.b16 %v287_v32  ;;  %v364_v41 = vunpack.c.l.b16 %v294_v33  ;;  %v365_v42 = vunpack.c.l.b16 %v295_v34 }
  0x28   : > { %v372_v43 = vunpack.c.l.b16 %v302_v35  ;;  %v373_v44 = vunpack.c.l.b16 %v303_v36  ;;  %v377_v45 = vpack.c.b16 %v349_v38, %v348_v37 }
  0x29   : > { %v381_v46 = vpack.c.b16 %v357_v40, %v356_v39  ;;  %v385_v47 = vpack.c.b16 %v365_v42, %v364_v41 }
  0x2a   : > { %v389_v48 = vpack.c.b16 %v373_v44, %v372_v43 }
  0x2b   : > { %1589 = vmatmul.msk.bf16.gmra.mxu0 %vm396_vm0, %v375_v53 }
  0x2c   : > { %1593 = vmatmul.msk.bf16.gmra.mxu1 %vm396_vm0, %v379_v54 }
  0x2d   : > { %1597 = vmatmul.msk.bf16.gmra.mxu2 %vm396_vm0, %v383_v55 }
  0x2e   : > { %1601 = vmatmul.msk.bf16.gmra.mxu3 %vm396_vm0, %v387_v56 }
  0x3b   : > { %1590 = vmatmul.msk.bf16.gmra.mxu0 %vm396_vm0, %v376_v17 }
  0x3c   : > { %1594 = vmatmul.msk.bf16.gmra.mxu1 %vm396_vm0, %v380_v18 }
  0x3d   : > { %1598 = vmatmul.msk.bf16.gmra.mxu2 %vm396_vm0, %v384_v19 }
  0x3e   : > { %1602 = vmatmul.msk.bf16.gmra.mxu3 %vm396_vm0, %v388_v20 }
  0x4b   : > { %1591 = vmatmul.msk.bf16.gmra.mxu0 %vm396_vm0, %v377_v45 }
  0x4c   : > { %1595 = vmatmul.msk.bf16.gmra.mxu1 %vm396_vm0, %v381_v46 }
  0x4d   : > { %1599 = vmatmul.msk.bf16.gmra.mxu2 %vm396_vm0, %v385_v47 }
  0x4e   : > { %1603 = vmatmul.msk.bf16.gmra.mxu3 %vm396_vm0, %v389_v48 }
  0x98   : > { %v454_v50 = vpop.f32.mrf.mxu0 }
  0x99   : > { %v455_v51 = vadd.f32 %v2219_v49, %v454_v50  ;;  %v474_v52 = vpop.f32.mrf.mxu1 }
  0x9a   : > { %v475_v53 = vadd.f32 %v2219_v49, %v474_v52 }
  0x9b   : > { %v534_v54 = vmax.f32 %v455_v51, 0.0 }
  0x9c   : > { %v542_v55 = vmax.f32 %v475_v53, 0.0 }
  0x9d   : > { %v566_v56 = vpack.c.bf16 %v534_v54, %v534_v54  ;;  %v632_v7 = vsel %vm631_vm2, %v534_v54, -inf }
  0x9e   : > { %v574_v57 = vpack.c.bf16 %v542_v55, %v542_v55  ;;  %v668_v13 = vsel %vm631_vm2, %v542_v55, -inf }
  0x9f   : > { %599 = vst.msk [vmem:[%s2226_s10] sm:$0xf] %vm598_vm1, %v566_v56 }
  0xa0   : > { %v494_v58 = vpop.f32.mrf.mxu2  ;;  %607 = vst.msk [vmem:[%s2226_s10 + $0x20] sm:$0xf] %vm598_vm1, %v574_v57  ;;  %v456_v60 = vpop.f32.mrf.mxu0 }
  0xa1   : > { %v495_v59 = vadd.f32 %v2219_v49, %v494_v58  ;;  %v514_v61 = vpop.f32.mrf.mxu3  ;;  %v457_v62 = vadd.f32 %v2219_v49, %v456_v60  ;;  %v476_v63 = vpop.f32.mrf.mxu1 }
  0xa2   : > { %v515_v1 = vadd.f32 %v2219_v49, %v514_v61  ;;  %v477_v2 = vadd.f32 %v2219_v49, %v476_v63  ;;  %v795_v63 = vld [vmem:[%s2280_s12] sm:$0x1] }
  0xa3   : > { %v550_v0 = vmax.f32 %v495_v59, 0.0  ;;  %v535_v3 = vmax.f32 %v457_v62, 0.0 }
  0xa4   : > { %v558_v5 = vmax.f32 %v515_v1, 0.0  ;;  %v543_v6 = vmax.f32 %v477_v2, 0.0 }
  0xa5   : > { %v582_v4 = vpack.c.bf16 %v550_v0, %v550_v0  ;;  %v567_v8 = vpack.c.bf16 %v535_v3, %v535_v3  ;;  %v633_v9 = vsel %vm631_vm2, %v535_v3, -inf  ;;  %v704_v27 = vsel %vm631_vm2, %v550_v0, -inf }
  0xa6   : > { %v590_v10 = vpack.c.bf16 %v558_v5, %v558_v5  ;;  %v634_v11 = vmax.f32 %v632_v7, %v633_v9  ;;  %v575_v12 = vpack.c.bf16 %v543_v6, %v543_v6  ;;  %v669_v14 = vsel %vm631_vm2, %v543_v6, -inf }
  0xa7   : > { %615 = vst.msk [vmem:[%s2226_s10 + $0x40] sm:$0xf] %vm598_vm1, %v582_v4  ;;  %v670_v17 = vmax.f32 %v668_v13, %v669_v14  ;;  %v740_v37 = vsel %vm631_vm2, %v558_v5, -inf }
  0xa8   : > { %600 = vst.msk [vmem:[%s2226_s10 + $0x4] sm:$0xf] %vm598_vm1, %v567_v8  ;;  %v496_v15 = vpop.f32.mrf.mxu2  ;;  %v635_v16 = vrot.slane %v634_v11, 4  ;;  %v459_v19 = vpop.f32.mrf.mxu0  ;;  %v807_v8 = vld [vmem:[%s2280_s12 + $0x4] sm:$0x1] }
  0xa9   : > { %623 = vst.msk [vmem:[%s2226_s10 + $0x60] sm:$0xf] %vm598_vm1, %v590_v10  ;;  %v497_v18 = vadd.f32 %v2219_v49, %v496_v15  ;;  %v516_v20 = vpop.f32.mrf.mxu3  ;;  %v460_v21 = vadd.f32 %v2219_v49, %v459_v19  ;;  %v479_v22 = vpop.f32.mrf.mxu1  ;;  %v671_v24 = vrot.slane %v670_v17, 4 }
  0xaa   : > { %608 = vst.msk [vmem:[%s2226_s10 + $0x24] sm:$0xf] %vm598_vm1, %v575_v12  ;;  %v636_v23 = vmax.f32 %v634_v11, %v635_v16  ;;  %v517_v26 = vadd.f32 %v2219_v49, %v516_v20  ;;  %v480_v29 = vadd.f32 %v2219_v49, %v479_v22 }
  0xab   : > { %v551_v25 = vmax.f32 %v497_v18, 0.0  ;;  %v536_v28 = vmax.f32 %v460_v21, 0.0  ;;  %v672_v31 = vmax.f32 %v670_v17, %v671_v24 }
  0xac   : > { %v637_v30 = vrot.slane %v636_v23, 2  ;;  %v559_v35 = vmax.f32 %v517_v26, 0.0  ;;  %v544_v40 = vmax.f32 %v480_v29, 0.0 }
  0xad   : > { %v583_v32 = vpack.c.bf16 %v551_v25, %v551_v25  ;;  %v705_v33 = vsel %vm631_vm2, %v551_v25, -inf  ;;  %v568_v36 = vpack.c.bf16 %v536_v28, %v536_v28  ;;  %v673_v39 = vrot.slane %v672_v31, 2 }
  0xae   : > { %v706_v34 = vmax.f32 %v704_v27, %v705_v33  ;;  %v638_v38 = vmax.f32 %v636_v23, %v637_v30  ;;  %v591_v42 = vpack.c.bf16 %v559_v35, %v559_v35  ;;  %v741_v43 = vsel %vm631_vm2, %v559_v35, -inf }
  0xaf   : > { %616 = vst.msk [vmem:[%s2226_s10 + $0x44] sm:$0xf] %vm598_vm1, %v583_v32  ;;  %v641_v44 = vsel %vm631_vm2, %v536_v28, -inf  ;;  %v674_v47 = vmax.f32 %v672_v31, %v673_v39  ;;  %v742_v48 = vmax.f32 %v740_v37, %v741_v43  ;;  %v576_v50 = vpack.c.bf16 %v544_v40, %v544_v40  ;;  %v819_v28 = vld [vmem:[%s2280_s12 + $0x8] sm:$0x1] }
  0xb0   : > { %v707_v41 = vrot.slane %v706_v34, 4  ;;  %601 = vst.msk [vmem:[%s2226_s10 + $0x8] sm:$0xf] %vm598_vm1, %v568_v36  ;;  %v499_v45 = vpop.f32.mrf.mxu2  ;;  %v639_v46 = vrot.slane %v638_v38, 1  ;;  %v461_v51 = vpop.f32.mrf.mxu0  ;;  %v677_v53 = vsel %vm631_vm2, %v544_v40, -inf }
  0xb1   : > { %624 = vst.msk [vmem:[%s2226_s10 + $0x64] sm:$0xf] %vm598_vm1, %v591_v42  ;;  %v500_v54 = vadd.f32 %v2219_v49, %v499_v45  ;;  %v519_v55 = vpop.f32.mrf.mxu3  ;;  %v462_v56 = vadd.f32 %v2219_v49, %v461_v51  ;;  %v481_v57 = vpop.f32.mrf.mxu1  ;;  %v675_v59 = vrot.slane %v674_v47, 1  ;;  %v743_v60 = vrot.slane %v742_v48, 4 }
  0xb2   : > { %v708_v52 = vmax.f32 %v706_v34, %v707_v41  ;;  %v640_v58 = vmax.f32 %v638_v38, %v639_v46  ;;  %609 = vst.msk [vmem:[%s2226_s10 + $0x28] sm:$0xf] %vm598_vm1, %v576_v50  ;;  %v520_v61 = vadd.f32 %v2219_v49, %v519_v55  ;;  %v482_v3 = vadd.f32 %v2219_v49, %v481_v57 }
  0xb3   : > { %v552_v1 = vmax.f32 %v500_v54, 0.0  ;;  %v537_v2 = vmax.f32 %v462_v56, 0.0  ;;  %v676_v5 = vmax.f32 %v674_v47, %v675_v59  ;;  %v744_v6 = vmax.f32 %v742_v48, %v743_v60  ;;  %v831_v47 = vld [vmem:[%s2280_s12 + $0xc] sm:$0x1] }
  0xb4   : > { %v709_v0 = vrot.slane %v708_v52, 2  ;;  %v776_v4 = vpack.c.bf16 %v640_v58, %v640_v58  ;;  %v560_v7 = vmax.f32 %v520_v61, 0.0  ;;  %v545_v20 = vmax.f32 %v482_v3, 0.0 }
  0xb5   : > { %v584_v10 = vpack.c.bf16 %v552_v1, %v552_v1  ;;  %v713_v11 = vsel %vm631_vm2, %v552_v1, -inf  ;;  %v569_v12 = vpack.c.bf16 %v537_v2, %v537_v2  ;;  %v780_v14 = vpack.c.bf16 %v676_v5, %v676_v5 }
  0xb6   : > { %v710_v9 = vmax.f32 %v708_v52, %v709_v0  ;;  %v796_v13 = vsel %vm2275_vm5, %v776_v4, %v795_v63  ;;  %v745_v15 = vrot.slane %v744_v6, 2  ;;  %v592_v16 = vpack.c.bf16 %v560_v7, %v560_v7 }
  0xb7   : > { %797 = vst [vmem:[%s2280_s12] sm:$0x1] %v796_v13  ;;  %v749_v18 = vsel %vm631_vm2, %v560_v7, -inf  ;;  %v642_v19 = vsel %vm631_vm2, %v537_v2, -inf  ;;  %v808_v22 = vsel %vm2275_vm5, %v780_v14, %v807_v8  ;;  %v577_v29 = vpack.c.bf16 %v545_v20, %v545_v20 }
  0xb8   : > { %v711_v17 = vrot.slane %v710_v9, 1  ;;  %v501_v21 = vpop.f32.mrf.mxu2  ;;  %v746_v23 = vmax.f32 %v744_v6, %v745_v15  ;;  %617 = vst.msk [vmem:[%s2226_s10 + $0x48] sm:$0xf] %vm598_vm1, %v584_v10  ;;  %v643_v24 = vmax.f32 %v641_v44, %v642_v19  ;;  %v464_v26 = vpop.f32.mrf.mxu0  ;;  %v678_v30 = vsel %vm631_vm2, %v545_v20, -inf }
  0xb9   : > { %v502_v25 = vadd.f32 %v2219_v49, %v501_v21  ;;  %809 = vst [vmem:[%s2280_s12 + $0x4] sm:$0x1] %v808_v22  ;;  %v521_v31 = vpop.f32.mrf.mxu3  ;;  %v465_v32 = vadd.f32 %v2219_v49, %v464_v26  ;;  %v484_v33 = vpop.f32.mrf.mxu1  ;;  %v679_v36 = vmax.f32 %v677_v53, %v678_v30  ;;  %v798_v21 = vld [vmem:[%s2280_s12 + $0x1] sm:$0x1] }
  0xba   : > { %v712_v27 = vmax.f32 %v710_v9, %v711_v17  ;;  %v747_v34 = vrot.slane %v746_v23, 1  ;;  %625 = vst.msk [vmem:[%s2226_s10 + $0x68] sm:$0xf] %vm598_vm1, %v592_v16  ;;  %v644_v35 = vrot.slane %v643_v24, 4  ;;  %v522_v39 = vadd.f32 %v2219_v49, %v521_v31 }
  0xbb   : > { %v553_v37 = vmax.f32 %v502_v25, 0.0  ;;  %602 = vst.msk [vmem:[%s2226_s10 + $0xc] sm:$0xf] %vm598_vm1, %v569_v12  ;;  %v538_v40 = vmax.f32 %v465_v32, 0.0  ;;  %v485_v41 = vadd.f32 %v2219_v49, %v484_v33  ;;  %v680_v44 = vrot.slane %v679_v36, 4 }
  0xbc   : > { %v784_v38 = vpack.c.bf16 %v712_v27, %v712_v27  ;;  %v748_v42 = vmax.f32 %v746_v23, %v747_v34  ;;  %v645_v43 = vmax.f32 %v643_v24, %v644_v35  ;;  %610 = vst.msk [vmem:[%s2226_s10 + $0x2c] sm:$0xf] %vm598_vm1, %v577_v29  ;;  %v561_v50 = vmax.f32 %v522_v39, 0.0 }
  0xbd   : > { %v585_v45 = vpack.c.bf16 %v553_v37, %v553_v37  ;;  %v714_v48 = vsel %vm631_vm2, %v553_v37, -inf  ;;  %v570_v51 = vpack.c.bf16 %v538_v40, %v538_v40  ;;  %v681_v54 = vmax.f32 %v679_v36, %v680_v44 }
  0xbe   : > { %v820_v46 = vsel %vm2275_vm5, %v784_v38, %v819_v28  ;;  %v788_v52 = vpack.c.bf16 %v748_v42, %v748_v42  ;;  %v646_v53 = vrot.slane %v645_v43, 2  ;;  %v715_v55 = vmax.f32 %v713_v11, %v714_v48  ;;  %v810_v28 = vld [vmem:[%s2280_s12 + $0x5] sm:$0x1]  ;;  %v822_v48 = vld [vmem:[%s2280_s12 + $0x9] sm:$0x1] }
  0xbf   : > { %821 = vst [vmem:[%s2280_s12 + $0x8] sm:$0x1] %v820_v46  ;;  %v593_v56 = vpack.c.bf16 %v561_v50, %v561_v50  ;;  %v750_v57 = vsel %vm631_vm2, %v561_v50, -inf  ;;  %v650_v58 = vsel %vm631_vm2, %v538_v40, -inf  ;;  %v546_v59 = vmax.f32 %v485_v41, 0.0 }
  0xc0   : > { %618 = vst.msk [vmem:[%s2226_s10 + $0x4c] sm:$0xf] %vm598_vm1, %v585_v45  ;;  %v504_v60 = vpop.f32.mrf.mxu2  ;;  %v832_v61 = vsel %vm2275_vm5, %v788_v52, %v831_v47  ;;  %v647_v63 = vmax.f32 %v645_v43, %v646_v53  ;;  %v682_v0 = vrot.slane %v681_v54, 2  ;;  %v716_v1 = vrot.slane %v715_v55, 4  ;;  %v466_v2 = vpop.f32.mrf.mxu0 }
  0xc1   : > { %603 = vst.msk [vmem:[%s2226_s10 + $0x10] sm:$0xf] %vm598_vm1, %v570_v51  ;;  %v751_v3 = vmax.f32 %v749_v18, %v750_v57  ;;  %v578_v4 = vpack.c.bf16 %v546_v59, %v546_v59  ;;  %v686_v5 = vsel %vm631_vm2, %v546_v59, -inf  ;;  %v505_v6 = vadd.f32 %v2219_v49, %v504_v60  ;;  %v524_v7 = vpop.f32.mrf.mxu3  ;;  %v486_v8 = vpop.f32.mrf.mxu1 }
  0xc2   : > { %833 = vst [vmem:[%s2280_s12 + $0xc] sm:$0x1] %v832_v61  ;;  %v648_v9 = vrot.slane %v647_v63, 1  ;;  %v683_v10 = vmax.f32 %v681_v54, %v682_v0  ;;  %v717_v11 = vmax.f32 %v715_v55, %v716_v1  ;;  %v525_v12 = vadd.f32 %v2219_v49, %v524_v7 }
  0xc3   : > { %626 = vst.msk [vmem:[%s2226_s10 + $0x6c] sm:$0xf] %vm598_vm1, %v593_v56  ;;  %v752_v13 = vrot.slane %v751_v3, 4  ;;  %v554_v14 = vmax.f32 %v505_v6, 0.0  ;;  %v467_v15 = vadd.f32 %v2219_v49, %v466_v2  ;;  %v487_v16 = vadd.f32 %v2219_v49, %v486_v8 }
  0xc4   : > { %611 = vst.msk [vmem:[%s2226_s10 + $0x30] sm:$0xf] %vm598_vm1, %v578_v4  ;;  %v649_v17 = vmax.f32 %v647_v63, %v648_v9  ;;  %v684_v18 = vrot.slane %v683_v10, 1  ;;  %v718_v19 = vrot.slane %v717_v11, 2  ;;  %v562_v20 = vmax.f32 %v525_v12, 0.0 }
  0xc5   : > { %v753_v22 = vmax.f32 %v751_v3, %v752_v13  ;;  %v586_v23 = vpack.c.bf16 %v554_v14, %v554_v14  ;;  %v722_v24 = vsel %vm631_vm2, %v554_v14, -inf  ;;  %v539_v25 = vmax.f32 %v467_v15, 0.0  ;;  %v834_v3 = vld [vmem:[%s2280_s12 + $0xd] sm:$0x1] }
  0xc6   : > { %v777_v26 = vpack.c.bf16 %v649_v17, %v649_v17  ;;  %v685_v27 = vmax.f32 %v683_v10, %v684_v18  ;;  %v719_v29 = vmax.f32 %v717_v11, %v718_v19  ;;  %v594_v30 = vpack.c.bf16 %v562_v20, %v562_v20 }
  0xc7   : > { %v754_v31 = vrot.slane %v753_v22, 2  ;;  %619 = vst.msk [vmem:[%s2226_s10 + $0x50] sm:$0xf] %vm598_vm1, %v586_v23  ;;  %v758_v32 = vsel %vm631_vm2, %v562_v20, -inf  ;;  %v571_v33 = vpack.c.bf16 %v539_v25, %v539_v25  ;;  %v651_v34 = vsel %vm631_vm2, %v539_v25, -inf }
  0xc8   : > { %v506_v35 = vpop.f32.mrf.mxu2  ;;  %v799_v36 = vsel %vm2275_vm5, %v777_v26, %v798_v21  ;;  %v781_v37 = vpack.c.bf16 %v685_v27, %v685_v27  ;;  %v720_v38 = vrot.slane %v719_v29, 1  ;;  %627 = vst.msk [vmem:[%s2226_s10 + $0x70] sm:$0xf] %vm598_vm1, %v594_v30  ;;  %v652_v39 = vmax.f32 %v650_v58, %v651_v34  ;;  %v469_v40 = vpop.f32.mrf.mxu0  ;;  %v801_v34 = vld [vmem:[%s2280_s12 + $0x2] sm:$0x1] }
  0xc9   : > { %800 = vst [vmem:[%s2280_s12 + $0x1] sm:$0x1] %v799_v36  ;;  %v755_v41 = vmax.f32 %v753_v22, %v754_v31  ;;  %v547_v42 = vmax.f32 %v487_v16, 0.0  ;;  %v507_v43 = vadd.f32 %v2219_v49, %v506_v35  ;;  %v526_v44 = vpop.f32.mrf.mxu3  ;;  %v470_v45 = vadd.f32 %v2219_v49, %v469_v40  ;;  %v489_v52 = vpop.f32.mrf.mxu1 }
  0xca   : > { %v811_v46 = vsel %vm2275_vm5, %v781_v37, %v810_v28  ;;  %v721_v47 = vmax.f32 %v719_v29, %v720_v38  ;;  %604 = vst.msk [vmem:[%s2226_s10 + $0x14] sm:$0xf] %vm598_vm1, %v571_v33  ;;  %v653_v50 = vrot.slane %v652_v39, 4  ;;  %v527_v51 = vadd.f32 %v2219_v49, %v526_v44 }
  0xcb   : > { %812 = vst [vmem:[%s2280_s12 + $0x5] sm:$0x1] %v811_v46  ;;  %v756_v53 = vrot.slane %v755_v41, 1  ;;  %v579_v54 = vpack.c.bf16 %v547_v42, %v547_v42  ;;  %v687_v55 = vsel %vm631_vm2, %v547_v42, -inf  ;;  %v555_v56 = vmax.f32 %v507_v43, 0.0 }
  0xcc   : > { %v785_v57 = vpack.c.bf16 %v721_v47, %v721_v47  ;;  %v654_v58 = vmax.f32 %v652_v39, %v653_v50  ;;  %v688_v59 = vmax.f32 %v686_v5, %v687_v55  ;;  %v563_v60 = vmax.f32 %v527_v51, 0.0 }
  0xcd   : > { %v757_v61 = vmax.f32 %v755_v41, %v756_v53  ;;  %612 = vst.msk [vmem:[%s2226_s10 + $0x34] sm:$0xf] %vm598_vm1, %v579_v54  ;;  %v587_v63 = vpack.c.bf16 %v555_v56, %v555_v56  ;;  %v723_v0 = vsel %vm631_vm2, %v555_v56, -inf  ;;  %v540_v1 = vmax.f32 %v470_v45, 0.0 }
  0xce   : > { %v823_v2 = vsel %vm2275_vm5, %v785_v57, %v822_v48  ;;  %v655_v4 = vrot.slane %v654_v58, 2  ;;  %v689_v6 = vrot.slane %v688_v59, 4  ;;  %v724_v7 = vmax.f32 %v722_v24, %v723_v0 }
  0xcf   : > { %824 = vst [vmem:[%s2280_s12 + $0x9] sm:$0x1] %v823_v2  ;;  %v789_v8 = vpack.c.bf16 %v757_v61, %v757_v61  ;;  %v595_v5 = vpack.c.bf16 %v563_v60, %v563_v60  ;;  %v759_v9 = vsel %vm631_vm2, %v563_v60, -inf  ;;  %v572_v10 = vpack.c.bf16 %v540_v1, %v540_v1 }
  0xd0   : > { %v509_v11 = vpop.f32.mrf.mxu2  ;;  %v656_v12 = vmax.f32 %v654_v58, %v655_v4  ;;  %v690_v13 = vmax.f32 %v688_v59, %v689_v6  ;;  %620 = vst.msk [vmem:[%s2226_s10 + $0x54] sm:$0xf] %vm598_vm1, %v587_v63  ;;  %v725_v14 = vrot.slane %v724_v7, 4  ;;  %v760_v15 = vmax.f32 %v758_v32, %v759_v9  ;;  %v471_v16 = vpop.f32.mrf.mxu0  ;;  %v825_v63 = vld [vmem:[%s2280_s12 + $0xa] sm:$0x1] }
  0xd1   : > { %v835_v17 = vsel %vm2275_vm5, %v789_v8, %v834_v3  ;;  %628 = vst.msk [vmem:[%s2226_s10 + $0x74] sm:$0xf] %vm598_vm1, %v595_v5  ;;  %v490_v18 = vadd.f32 %v2219_v49, %v489_v52  ;;  %v510_v19 = vadd.f32 %v2219_v49, %v509_v11  ;;  %v529_v20 = vpop.f32.mrf.mxu3  ;;  %v472_v28 = vadd.f32 %v2219_v49, %v471_v16  ;;  %v491_v33 = vpop.f32.mrf.mxu1  ;;  %v813_v52 = vld [vmem:[%s2280_s12 + $0x6] sm:$0x1]  ;;  %v837_v8 = vld [vmem:[%s2280_s12 + $0xe] sm:$0x1] }
  0xd2   : > { %836 = vst [vmem:[%s2280_s12 + $0xd] sm:$0x1] %v835_v17  ;;  %v657_v21 = vrot.slane %v656_v12, 1  ;;  %v691_v22 = vrot.slane %v690_v13, 2  ;;  %v726_v23 = vmax.f32 %v724_v7, %v725_v14  ;;  %v761_v24 = vrot.slane %v760_v15, 4 }
  0xd3   : > { %605 = vst.msk [vmem:[%s2226_s10 + $0x18] sm:$0xf] %vm598_vm1, %v572_v10  ;;  %v548_v25 = vmax.f32 %v490_v18, 0.0  ;;  %v556_v26 = vmax.f32 %v510_v19, 0.0  ;;  %v530_v27 = vadd.f32 %v2219_v49, %v529_v20  ;;  %v659_v35 = vsel %vm631_vm2, %v540_v1, -inf }
  0xd4   : > { %v658_v29 = vmax.f32 %v656_v12, %v657_v21  ;;  %v692_v30 = vmax.f32 %v690_v13, %v691_v22  ;;  %v727_v31 = vrot.slane %v726_v23, 2  ;;  %v762_v32 = vmax.f32 %v760_v15, %v761_v24 }
  0xd5   : > { %v580_v36 = vpack.c.bf16 %v548_v25, %v548_v25  ;;  %v588_v37 = vpack.c.bf16 %v556_v26, %v556_v26  ;;  %v695_v42 = vsel %vm631_vm2, %v548_v25, -inf  ;;  %v564_v43 = vmax.f32 %v530_v27, 0.0 }
  0xd6   : > { %v778_v38 = vpack.c.bf16 %v658_v29, %v658_v29  ;;  %v693_v39 = vrot.slane %v692_v30, 1  ;;  %v728_v40 = vmax.f32 %v726_v23, %v727_v31  ;;  %v763_v41 = vrot.slane %v762_v32, 2 }
  0xd7   : > { %613 = vst.msk [vmem:[%s2226_s10 + $0x38] sm:$0xf] %vm598_vm1, %v580_v36  ;;  %v541_v44 = vmax.f32 %v472_v28, 0.0  ;;  %v492_v45 = vadd.f32 %v2219_v49, %v491_v33  ;;  %v731_v53 = vsel %vm631_vm2, %v556_v26, -inf  ;;  %v596_v54 = vpack.c.bf16 %v564_v43, %v564_v43  ;;  %v804_v36 = vld [vmem:[%s2280_s12 + $0x3] sm:$0x1] }
  0xd8   : > { %v802_v46 = vsel %vm2275_vm5, %v778_v38, %v801_v34  ;;  %v694_v47 = vmax.f32 %v692_v30, %v693_v39  ;;  %v729_v48 = vrot.slane %v728_v40, 1  ;;  %v764_v50 = vmax.f32 %v762_v32, %v763_v41  ;;  %621 = vst.msk [vmem:[%s2226_s10 + $0x58] sm:$0xf] %vm598_vm1, %v588_v37  ;;  %v511_v51 = vpop.f32.mrf.mxu2 }
  0xd9   : > { %803 = vst [vmem:[%s2280_s12 + $0x2] sm:$0x1] %v802_v46  ;;  %v573_v55 = vpack.c.bf16 %v541_v44, %v541_v44  ;;  %v660_v56 = vsel %vm631_vm2, %v541_v44, -inf  ;;  %v531_v57 = vpop.f32.mrf.mxu3  ;;  %v767_v0 = vsel %vm631_vm2, %v564_v43, -inf  ;;  %v549_v1 = vmax.f32 %v492_v45, 0.0 }
  0xda   : > { %v782_v58 = vpack.c.bf16 %v694_v47, %v694_v47  ;;  %v730_v59 = vmax.f32 %v728_v40, %v729_v48  ;;  %v765_v60 = vrot.slane %v764_v50, 1  ;;  %v661_v61 = vmax.f32 %v659_v35, %v660_v56  ;;  %629 = vst.msk [vmem:[%s2226_s10 + $0x78] sm:$0xf] %vm598_vm1, %v596_v54  ;;  %v816_v45 = vld [vmem:[%s2280_s12 + $0x7] sm:$0x1] }
  0xdb   : > { %v512_v2 = vadd.f32 %v2219_v49, %v511_v51  ;;  %v532_v3 = vadd.f32 %v2219_v49, %v531_v57  ;;  %606 = vst.msk [vmem:[%s2226_s10 + $0x1c] sm:$0xf] %vm598_vm1, %v573_v55  ;;  %v581_v9 = vpack.c.bf16 %v549_v1, %v549_v1  ;;  %v696_v10 = vsel %vm631_vm2, %v549_v1, -inf  ;;  %v840_v54 = vld [vmem:[%s2280_s12 + $0xf] sm:$0x1] }
  0xdc   : > { %v814_v4 = vsel %vm2275_vm5, %v782_v58, %v813_v52  ;;  %v786_v6 = vpack.c.bf16 %v730_v59, %v730_v59  ;;  %v766_v7 = vmax.f32 %v764_v50, %v765_v60  ;;  %v662_v5 = vrot.slane %v661_v61, 4  ;;  %v828_v50 = vld [vmem:[%s2280_s12 + $0xb] sm:$0x1] }
  0xdd   : > { %815 = vst [vmem:[%s2280_s12 + $0x6] sm:$0x1] %v814_v4  ;;  %v557_v11 = vmax.f32 %v512_v2, 0.0  ;;  %v565_v12 = vmax.f32 %v532_v3, 0.0  ;;  %v697_v15 = vmax.f32 %v695_v42, %v696_v10 }
  0xde   : > { %v826_v49 = vsel %vm2275_vm5, %v786_v6, %v825_v63  ;;  %v790_v13 = vpack.c.bf16 %v766_v7, %v766_v7  ;;  %v663_v14 = vmax.f32 %v661_v61, %v662_v5  ;;  %614 = vst.msk [vmem:[%s2226_s10 + $0x3c] sm:$0xf] %vm598_vm1, %v581_v9 }
  0xdf   : > { %827 = vst [vmem:[%s2280_s12 + $0xa] sm:$0x1] %v826_v49  ;;  %v589_v16 = vpack.c.bf16 %v557_v11, %v557_v11  ;;  %v732_v17 = vsel %vm631_vm2, %v557_v11, -inf  ;;  %v597_v18 = vpack.c.bf16 %v565_v12, %v565_v12  ;;  %v768_v19 = vsel %vm631_vm2, %v565_v12, -inf }
  0xe0   : > { %v838_v20 = vsel %vm2275_vm5, %v790_v13, %v837_v8  ;;  %v664_v21 = vrot.slane %v663_v14, 2  ;;  %v698_v22 = vrot.slane %v697_v15, 4  ;;  %v733_v23 = vmax.f32 %v731_v53, %v732_v17 }
  0xe1   : > { %839 = vst [vmem:[%s2280_s12 + $0xe] sm:$0x1] %v838_v20  ;;  %v769_v24 = vmax.f32 %v767_v0, %v768_v19 }
  0xe2   : > { %v665_v25 = vmax.f32 %v663_v14, %v664_v21  ;;  %v699_v26 = vmax.f32 %v697_v15, %v698_v22  ;;  %622 = vst.msk [vmem:[%s2226_s10 + $0x5c] sm:$0xf] %vm598_vm1, %v589_v16  ;;  %v734_v27 = vrot.slane %v733_v23, 4 }
  0xe3   : > { %630 = vst.msk [vmem:[%s2226_s10 + $0x7c] sm:$0xf] %vm598_vm1, %v597_v18  ;;  %v770_v28 = vrot.slane %v769_v24, 4 }
  0xe4   : > { %v666_v29 = vrot.slane %v665_v25, 1  ;;  %v700_v30 = vrot.slane %v699_v26, 2  ;;  %v735_v31 = vmax.f32 %v733_v23, %v734_v27 }
  0xe5   : > { %v771_v32 = vmax.f32 %v769_v24, %v770_v28 }
  0xe6   : > { %v667_v33 = vmax.f32 %v665_v25, %v666_v29  ;;  %v701_v34 = vmax.f32 %v699_v26, %v700_v30  ;;  %v736_v35 = vrot.slane %v735_v31, 2 }
  0xe7   : > { %v772_v37 = vrot.slane %v771_v32, 2 }
  0xe8   : > { %v779_v38 = vpack.c.bf16 %v667_v33, %v667_v33  ;;  %v702_v39 = vrot.slane %v701_v34, 1  ;;  %v737_v40 = vmax.f32 %v735_v31, %v736_v35 }
  0xe9   : > { %v773_v41 = vmax.f32 %v771_v32, %v772_v37 }
  0xea   : > { %v805_v42 = vsel %vm2275_vm5, %v779_v38, %v804_v36  ;;  %v703_v43 = vmax.f32 %v701_v34, %v702_v39  ;;  %v738_v44 = vrot.slane %v737_v40, 1 }
  0xeb   : > { %806 = vst [vmem:[%s2280_s12 + $0x3] sm:$0x1] %v805_v42  ;;  %v774_v46 = vrot.slane %v773_v41, 1 }
  0xec   : > { %v783_v47 = vpack.c.bf16 %v703_v43, %v703_v43  ;;  %v739_v48 = vmax.f32 %v737_v40, %v738_v44 }
  0xed   : > { %v775_v51 = vmax.f32 %v773_v41, %v774_v46 }
  0xee   : > { %v817_v52 = vsel %vm2275_vm5, %v783_v47, %v816_v45  ;;  %v787_v53 = vpack.c.bf16 %v739_v48, %v739_v48  ;;  %853 = sbr.rel (!%p2151_p4) target bundleno = 307 (0x133), region = 36 }
  0xef   : > { %818 = vst [vmem:[%s2280_s12 + $0x7] sm:$0x1] %v817_v52  ;;  %v791_v55 = vpack.c.bf16 %v775_v51, %v775_v51 }
  0xf0   : > { %v829_v56 = vsel %vm2275_vm5, %v787_v53, %v828_v50 }
  0xf1   : > { %830 = vst [vmem:[%s2280_s12 + $0xb] sm:$0x1] %v829_v56  ;;  %v841_v57 = vsel %vm2275_vm5, %v791_v55, %v840_v54 }
  0xf2   : > { %842 = vst [vmem:[%s2280_s12 + $0xf] sm:$0x1] %v841_v57 }
  0xf3   : > { %s2888_s13 = smov (!%p856_p8, %s855_s13), 16 }
  0xf4   : > { %s1652_s21 = sshll.u32 %s2888_s13, 3  ;;  %s1612_s24 = sshll.u32 %s2888_s13, 1 }
  0xf5   : > { %p1613_p9 = scmp.eq.s32.totalorder %s1652_s21, 0 }
  0xf6   : > { %s2446_s25 = sshrl.u32 (!%p1613_p9), %s1612_s24, 5 }
  0xf7   : > { %867 = sbr.rel (%p1613_p9) target bundleno = 307 (0x133), region = 40  ;;  %p1614_p10 = scmp.le.s32.totalorder (!%p1613_p9), %s2446_s25, 0 }
  0xfc   : > { %1466 = sbr.rel (%p1614_p10) target bundleno = 290 (0x122), region = 208  ;;  %s2869_s18 = smov (!%p1614_p10), %s2438_s20 }
  0xfd   : > { %s2870_s27 = smov (!%p1614_p10), %s2226_s10  ;;  %s2455_s28 = smov (!%p1614_p10), 0  }
  0xfe   : > { %s2457_s29 = smov (!%p1614_p10), 0  }
 0x101 LB: >> { %v884_v62 = vld [vmem:[%s2009_s27] sm:$0xf]  ;;  %v886_v58 = vld [vmem:[%s2009_s27 + $0x4] sm:$0xf]  ;;  %v888_v59 = vld [vmem:[%s2009_s27 + $0x8] sm:$0xf]  ;;  %s2017_s29 = sphi %s2457_s29, %s878_s29   ;;  %s2013_s28 = sphi %s2455_s28, %s2873_s28   ;;  %s2009_s27 = sphi %s2870_s27, %s2872_s27   ;;  %s2005_s18 = sphi %s2869_s18, %s2871_s18  }
 0x102   : >> { %885 = vst [vmem:[%s2005_s18] sm:$0xf] %v884_v62  ;;  %v890_v60 = vld [vmem:[%s2009_s27 + $0xc] sm:$0xf]  ;;  %v892_v61 = vld [vmem:[%s2009_s27 + $0x10] sm:$0xf]  ;;  %s948_s30 = sadd.s32 1, %s2013_s28 }
 0x103   : >> { %887 = vst [vmem:[%s2005_s18 + $0x4] sm:$0xf] %v886_v58  ;;  %v894_v63 = vld [vmem:[%s2009_s27 + $0x14] sm:$0xf]  ;;  %v896_v0 = vld [vmem:[%s2009_s27 + $0x18] sm:$0xf]  ;;  %p949_p11 = scmp.ge.s32.totalorder %s948_s30, %s2446_s25 }
 0x104   : >> { %889 = vst [vmem:[%s2005_s18 + $0x8] sm:$0xf] %v888_v59  ;;  %v898_v1 = vld [vmem:[%s2009_s27 + $0x1c] sm:$0xf]  ;;  %v900_v2 = vld [vmem:[%s2009_s27 + $0x20] sm:$0xf] }
 0x105   : >> { %891 = vst [vmem:[%s2005_s18 + $0xc] sm:$0xf] %v890_v60  ;;  %v902_v3 = vld [vmem:[%s2009_s27 + $0x24] sm:$0xf]  ;;  %v904_v4 = vld [vmem:[%s2009_s27 + $0x28] sm:$0xf] }
 0x106   : >> { %893 = vst [vmem:[%s2005_s18 + $0x10] sm:$0xf] %v892_v61  ;;  %v906_v6 = vld [vmem:[%s2009_s27 + $0x2c] sm:$0xf]  ;;  %v908_v7 = vld [vmem:[%s2009_s27 + $0x30] sm:$0xf] }
 0x107   : >> { %895 = vst [vmem:[%s2005_s18 + $0x14] sm:$0xf] %v894_v63  ;;  %v910_v8 = vld [vmem:[%s2009_s27 + $0x34] sm:$0xf]  ;;  %v912_v5 = vld [vmem:[%s2009_s27 + $0x38] sm:$0xf] }
 0x108   : >> { %897 = vst [vmem:[%s2005_s18 + $0x18] sm:$0xf] %v896_v0  ;;  %v914_v9 = vld [vmem:[%s2009_s27 + $0x3c] sm:$0xf]  ;;  %v916_v10 = vld [vmem:[%s2009_s27 + $0x40] sm:$0xf] }
 0x109   : >> { %899 = vst [vmem:[%s2005_s18 + $0x1c] sm:$0xf] %v898_v1  ;;  %v918_v11 = vld [vmem:[%s2009_s27 + $0x44] sm:$0xf]  ;;  %s2890_s30 = smov (%p949_p11, %s948_s30), 0  ;;  %s878_s29 = sadd.s32 1, %s2017_s29  }
 0x10a   : >> { %901 = vst [vmem:[%s2005_s18 + $0x20] sm:$0xf] %v900_v2  ;;  %v920_v12 = vld [vmem:[%s2009_s27 + $0x48] sm:$0xf]  ;;  %v922_v49 = vld [vmem:[%s2009_s27 + $0x4c] sm:$0xf]  ;;  %p877_p12 = scmp.ge.s32.totalorder %s878_s29, %s2446_s25  ;;  %s2873_s28 = smov %s2890_s30 }
 0x10b   : >> { %903 = vst [vmem:[%s2005_s18 + $0x24] sm:$0xf] %v902_v3  ;;  %s1615_s5 = sshll.u32 %s2890_s30, 7  ;;  %v924_v13 = vld [vmem:[%s2009_s27 + $0x50] sm:$0xf] }
 0x10c   : >> { %905 = vst [vmem:[%s2005_s18 + $0x28] sm:$0xf] %v904_v4  ;;  %s2516_s6 = scalar_lea.vmem %s2226_s10, %s1615_s5 [#allocation2]   ;;  %s954_s7 = scalar_lea.vmem %s2438_s20, %s1615_s5   ;;  %v926_v14 = vld [vmem:[%s2009_s27 + $0x54] sm:$0xf]  ;;  %v928_v15 = vld [vmem:[%s2009_s27 + $0x58] sm:$0xf] }
 0x10d   : >> { %907 = vst [vmem:[%s2005_s18 + $0x2c] sm:$0xf] %v906_v6  ;;  %v930_v16 = vld [vmem:[%s2009_s27 + $0x5c] sm:$0xf]  ;;  %v932_v17 = vld [vmem:[%s2009_s27 + $0x60] sm:$0xf] }
 0x10e   : >> { %909 = vst [vmem:[%s2005_s18 + $0x30] sm:$0xf] %v908_v7  ;;  %v934_v18 = vld [vmem:[%s2009_s27 + $0x64] sm:$0xf]  ;;  %v936_v19 = vld [vmem:[%s2009_s27 + $0x68] sm:$0xf] }
 0x10f   : >> { %911 = vst [vmem:[%s2005_s18 + $0x34] sm:$0xf] %v910_v8  ;;  %v938_v20 = vld [vmem:[%s2009_s27 + $0x6c] sm:$0xf]  ;;  %v940_v21 = vld [vmem:[%s2009_s27 + $0x70] sm:$0xf] }
 0x110   : >> { %913 = vst [vmem:[%s2005_s18 + $0x38] sm:$0xf] %v912_v5  ;;  %v942_v22 = vld [vmem:[%s2009_s27 + $0x74] sm:$0xf]  ;;  %v944_v23 = vld [vmem:[%s2009_s27 + $0x78] sm:$0xf] }
 0x111   : >> { %915 = vst [vmem:[%s2005_s18 + $0x3c] sm:$0xf] %v914_v9  ;;  %v946_v24 = vld [vmem:[%s2009_s27 + $0x7c] sm:$0xf]  ;;  %s2872_s27 = smov %s2516_s6 }
 0x112   : >> { %917 = vst [vmem:[%s2005_s18 + $0x40] sm:$0xf] %v916_v10 }
 0x113   : >> { %919 = vst [vmem:[%s2005_s18 + $0x44] sm:$0xf] %v918_v11 }
 0x114   : >> { %921 = vst [vmem:[%s2005_s18 + $0x48] sm:$0xf] %v920_v12 }
 0x115   : >> { %923 = vst [vmem:[%s2005_s18 + $0x4c] sm:$0xf] %v922_v49 }
 0x116   : >> { %925 = vst [vmem:[%s2005_s18 + $0x50] sm:$0xf] %v924_v13 }
 0x117   : >> { %927 = vst [vmem:[%s2005_s18 + $0x54] sm:$0xf] %v926_v14 }
 0x118   : >> { %929 = vst [vmem:[%s2005_s18 + $0x58] sm:$0xf] %v928_v15 }
 0x119   : >> { %931 = vst [vmem:[%s2005_s18 + $0x5c] sm:$0xf] %v930_v16 }
 0x11a   : >> { %933 = vst [vmem:[%s2005_s18 + $0x60] sm:$0xf] %v932_v17 }
 0x11b   : >> { %935 = vst [vmem:[%s2005_s18 + $0x64] sm:$0xf] %v934_v18 }
 0x11c   : >> { %937 = vst [vmem:[%s2005_s18 + $0x68] sm:$0xf] %v936_v19 }
 0x11d   : >> { %939 = vst [vmem:[%s2005_s18 + $0x6c] sm:$0xf] %v938_v20  ;;  %880 = sbr.rel (!%p877_p12) target bundleno = 257 (0x101), region = 214 }
 0x11e   : >> { %941 = vst [vmem:[%s2005_s18 + $0x70] sm:$0xf] %v940_v21 }
 0x11f   : >> { %943 = vst [vmem:[%s2005_s18 + $0x74] sm:$0xf] %v942_v22 }
 0x120   : >> { %945 = vst [vmem:[%s2005_s18 + $0x78] sm:$0xf] %v944_v23 }
 0x121   : >> { %947 = vst [vmem:[%s2005_s18 + $0x7c] sm:$0xf] %v946_v24  ;;  %s2871_s18 = smov %s954_s7 }
 0x122 PF: > { %s2558_s8 = sand.u32 31, %s1612_s24   ;;  %s1655_s9 = sshll.u32 %s2446_s25, 7 }
 0x123   : > { %s959_s11 = scalar_lea.vmem %s2226_s10, %s1655_s9 [#allocation2]   ;;  %s961_s14 = scalar_lea.vmem %s2438_s20, %s1655_s9  }
 0x124   : > { %p1620_p13 = scmp.le.s32.totalorder %s2558_s8, 0 }
 0x125   : > { %s2019_s15 = smov (!%p1620_p13), %s961_s14   ;;  %s2023_s17 = smov (!%p1620_p13), %s959_s11  }
 0x126   : > { %1480 = sbr.rel (%p1620_p13) target bundleno = 307 (0x133), region = 219  ;;  %s2027_s21 = smov (!%p1620_p13), 0  }
 0x127   : > { %s2031_s30 = smov (!%p1620_p13), 0  }
 0x12b LB: >> { %v971_v25 = vld [vmem:[%s2025_s17] sm:$0xf]  ;;  %s973_s13 = sadd.s32 1, %s2029_s21  ;;  %s965_s30 = sadd.s32 1, %s2033_s30   ;;  %s2033_s30 = sphi %s2031_s30, %s965_s30   ;;  %s2029_s21 = sphi %s2027_s21, %s2028_s21   ;;  %s2025_s17 = sphi %s2023_s17, %s978_s17   ;;  %s2021_s15 = sphi %s2019_s15, %s979_s15  }
 0x12c   : >> { %972 = vst [vmem:[%s2021_s15] sm:$0xf] %v971_v25  ;;  %p974_p0 = scmp.ge.s32.totalorder %s973_s13, %s2558_s8  ;;  %p964_p1 = scmp.ge.s32.totalorder %s965_s30, %s2558_s8 }
 0x12e   : >> { %s2892_s13 = smov (%p974_p0, %s973_s13), 0  ;;  %967 = sbr.rel (!%p964_p1) target bundleno = 299 (0x12b), region = 225 }
 0x12f   : >> { %s1621_s10 = sshll.u32 %s2892_s13, 2  ;;  %s2028_s21 = smov %s2892_s13  }
 0x130   : >> { %s978_s17 = scalar_lea.vmem %s959_s11, %s1621_s10 [#allocation2]   ;;  %s979_s15 = scalar_lea.vmem %s961_s14, %s1621_s10  }
 0x133 PF: > { %1093 = sbr.rel (!%p2151_p4) target bundleno = 459 (0x1cb), region = 84  ;;  %s1095_s20 = ssub.s32 (%p2151_p4), 200, %s2159_s26 }
 0x134   : > { %s2573_s18 = scalar_lea.vmem (%p2151_p4), %s2865_s4, %s2159_s26   ;;  %p1096_p2 = scmp.lt.s32.totalorder (%p2151_p4), %s1095_s20, 16 }
 0x138   : > { %s2894_s20 = smov (!%p1096_p2, %s1095_s20), 16 }
 0x139   : > { %p1625_p3 = scmp.eq.s32.totalorder %s2894_s20, 0 }
 0x13a   : > { %p1103_p5 = scmp.lt.u32.totalorder (!%p1625_p3), %s2894_s20, 8 }
 0x13b   : > { %1102 = sbr.rel (%p1625_p3) target bundleno = 459 (0x1cb), region = 88 }
 0x140   : > { %1106 = sbr.rel (%p1103_p5) target bundleno = 450 (0x1c2), region = 92  ;;  %s2580_s23 = sand.u32 (!%p1103_p5), 7, %s2894_s20  }
 0x141   : > { %p1123_p4 = scmp.eq.s32.totalorder (!%p1103_p5), %s2580_s23, 0  ;;  %p1626_p6 = scmp.ne.s32.totalorder (!%p1103_p5), %s2580_s23, 0 }
 0x145   : > { %1126 = sbr.rel (%p1626_p6) target bundleno = 385 (0x181), region = 107  ;;  %s1127_s26 = sshrl.u32 (!%p1626_p6), %s2894_s20, 3 }
 0x146   : > { %s2587_s27 = sshrl.u32 (!%p1626_p6), %s1127_s26, 5 }
 0x147   : > { %p1627_p7 = scmp.le.s32.totalorder (!%p1626_p6), %s2587_s27, 0 }
 0x14a   : > { %1494 = sbr.rel (%p1627_p7) target bundleno = 368 (0x170), region = 230  ;;  %s2874_s28 = smov (!%p1627_p7), %s2573_s18 }
 0x14b   : > { %s2875_s29 = smov (!%p1627_p7), %s2280_s12  ;;  %s2596_s5 = smov (!%p1627_p7), 0  }
 0x14c   : > { %s2598_s6 = smov (!%p1627_p7), 0  }
 0x14f LB: >> { %v1138_v26 = vld [vmem:[%s2041_s29] sm:$0xff]  ;;  %v1140_v27 = vld [vmem:[%s2041_s29 + $0x8] sm:$0xff]  ;;  %v1142_v28 = vld [vmem:[%s2041_s29 + $0x10] sm:$0xff]  ;;  %s1202_s7 = sadd.s32 1, %s2045_s5  ;;  %s1132_s6 = sadd.s32 1, %s2049_s6   ;;  %s2049_s6 = sphi %s2598_s6, %s1132_s6   ;;  %s2045_s5 = sphi %s2596_s5, %s2878_s5   ;;  %s2041_s29 = sphi %s2875_s29, %s2877_s29   ;;  %s2037_s28 = sphi %s2874_s28, %s2876_s28  }
 0x150   : >> { %1139 = vst [vmem:[%s2037_s28] sm:$0xff] %v1138_v26  ;;  %v1144_v29 = vld [vmem:[%s2041_s29 + $0x18] sm:$0xff]  ;;  %p1203_p8 = scmp.ge.s32.totalorder %s1202_s7, %s2587_s27  ;;  %v1146_v30 = vld [vmem:[%s2041_s29 + $0x20] sm:$0xff]  ;;  %v1148_v31 = vld [vmem:[%s2041_s29 + $0x28] sm:$0xff]  ;;  %p1131_p9 = scmp.ge.s32.totalorder %s1132_s6, %s2587_s27 }
 0x151   : >> { %1141 = vst [vmem:[%s2037_s28 + $0x8] sm:$0xff] %v1140_v27  ;;  %v1150_v32 = vld [vmem:[%s2041_s29 + $0x30] sm:$0xff]  ;;  %v1152_v33 = vld [vmem:[%s2041_s29 + $0x38] sm:$0xff]  ;;  %v1154_v34 = vld [vmem:[%s2041_s29 + $0x40] sm:$0xff] }
 0x152   : >> { %1143 = vst [vmem:[%s2037_s28 + $0x10] sm:$0xff] %v1142_v28  ;;  %s2896_s7 = smov (%p1203_p8, %s1202_s7), 0  ;;  %v1156_v35 = vld [vmem:[%s2041_s29 + $0x48] sm:$0xff]  ;;  %v1158_v36 = vld [vmem:[%s2041_s29 + $0x50] sm:$0xff]  ;;  %v1160_v37 = vld [vmem:[%s2041_s29 + $0x58] sm:$0xff] }
 0x153   : >> { %1145 = vst [vmem:[%s2037_s28 + $0x18] sm:$0xff] %v1144_v29  ;;  %s1628_s8 = sshll.u32 %s2896_s7, 8  ;;  %v1162_v38 = vld [vmem:[%s2041_s29 + $0x60] sm:$0xff]  ;;  %v1164_v39 = vld [vmem:[%s2041_s29 + $0x68] sm:$0xff]  ;;  %v1166_v40 = vld [vmem:[%s2041_s29 + $0x70] sm:$0xff]  ;;  %s2878_s5 = smov %s2896_s7 }
 0x154   : >> { %1147 = vst [vmem:[%s2037_s28 + $0x20] sm:$0xff] %v1146_v30  ;;  %s2630_s9 = scalar_lea.vmem %s2280_s12, %s1628_s8 [#allocation3]   ;;  %s2633_s11 = scalar_lea.vmem %s2573_s18, %s1628_s8   ;;  %v1168_v41 = vld [vmem:[%s2041_s29 + $0x78] sm:$0xff]  ;;  %v1170_v42 = vld [vmem:[%s2041_s29 + $0x80] sm:$0xff]  ;;  %v1172_v43 = vld [vmem:[%s2041_s29 + $0x88] sm:$0xff] }
 0x155   : >> { %1149 = vst [vmem:[%s2037_s28 + $0x28] sm:$0xff] %v1148_v31  ;;  %v1174_v44 = vld [vmem:[%s2041_s29 + $0x90] sm:$0xff]  ;;  %v1176_v45 = vld [vmem:[%s2041_s29 + $0x98] sm:$0xff]  ;;  %v1178_v46 = vld [vmem:[%s2041_s29 + $0xa0] sm:$0xff] }
 0x156   : >> { %1151 = vst [vmem:[%s2037_s28 + $0x30] sm:$0xff] %v1150_v32  ;;  %v1180_v47 = vld [vmem:[%s2041_s29 + $0xa8] sm:$0xff]  ;;  %v1182_v48 = vld [vmem:[%s2041_s29 + $0xb0] sm:$0xff]  ;;  %v1184_v50 = vld [vmem:[%s2041_s29 + $0xb8] sm:$0xff] }
 0x157   : >> { %1153 = vst [vmem:[%s2037_s28 + $0x38] sm:$0xff] %v1152_v33  ;;  %v1186_v51 = vld [vmem:[%s2041_s29 + $0xc0] sm:$0xff]  ;;  %v1188_v52 = vld [vmem:[%s2041_s29 + $0xc8] sm:$0xff]  ;;  %v1190_v53 = vld [vmem:[%s2041_s29 + $0xd0] sm:$0xff] }
 0x158   : >> { %1155 = vst [vmem:[%s2037_s28 + $0x40] sm:$0xff] %v1154_v34  ;;  %v1192_v54 = vld [vmem:[%s2041_s29 + $0xd8] sm:$0xff]  ;;  %v1194_v55 = vld [vmem:[%s2041_s29 + $0xe0] sm:$0xff]  ;;  %v1196_v56 = vld [vmem:[%s2041_s29 + $0xe8] sm:$0xff] }
 0x159   : >> { %1157 = vst [vmem:[%s2037_s28 + $0x48] sm:$0xff] %v1156_v35  ;;  %v1198_v57 = vld [vmem:[%s2041_s29 + $0xf0] sm:$0xff]  ;;  %v1200_v62 = vld [vmem:[%s2041_s29 + $0xf8] sm:$0xff]  ;;  %s2877_s29 = smov %s2630_s9 }
 0x15a   : >> { %1159 = vst [vmem:[%s2037_s28 + $0x50] sm:$0xff] %v1158_v36 }
 0x15b   : >> { %1161 = vst [vmem:[%s2037_s28 + $0x58] sm:$0xff] %v1160_v37 }
 0x15c   : >> { %1163 = vst [vmem:[%s2037_s28 + $0x60] sm:$0xff] %v1162_v38 }
 0x15d   : >> { %1165 = vst [vmem:[%s2037_s28 + $0x68] sm:$0xff] %v1164_v39 }
 0x15e   : >> { %1167 = vst [vmem:[%s2037_s28 + $0x70] sm:$0xff] %v1166_v40 }
 0x15f   : >> { %1169 = vst [vmem:[%s2037_s28 + $0x78] sm:$0xff] %v1168_v41 }
 0x160   : >> { %1171 = vst [vmem:[%s2037_s28 + $0x80] sm:$0xff] %v1170_v42 }
 0x161   : >> { %1173 = vst [vmem:[%s2037_s28 + $0x88] sm:$0xff] %v1172_v43 }
 0x162   : >> { %1175 = vst [vmem:[%s2037_s28 + $0x90] sm:$0xff] %v1174_v44 }
 0x163   : >> { %1177 = vst [vmem:[%s2037_s28 + $0x98] sm:$0xff] %v1176_v45 }
 0x164   : >> { %1179 = vst [vmem:[%s2037_s28 + $0xa0] sm:$0xff] %v1178_v46 }
 0x165   : >> { %1181 = vst [vmem:[%s2037_s28 + $0xa8] sm:$0xff] %v1180_v47 }
 0x166   : >> { %1183 = vst [vmem:[%s2037_s28 + $0xb0] sm:$0xff] %v1182_v48 }
 0x167   : >> { %1185 = vst [vmem:[%s2037_s28 + $0xb8] sm:$0xff] %v1184_v50 }
 0x168   : >> { %1187 = vst [vmem:[%s2037_s28 + $0xc0] sm:$0xff] %v1186_v51 }
 0x169   : >> { %1189 = vst [vmem:[%s2037_s28 + $0xc8] sm:$0xff] %v1188_v52 }
 0x16a   : >> { %1191 = vst [vmem:[%s2037_s28 + $0xd0] sm:$0xff] %v1190_v53 }
 0x16b   : >> { %1193 = vst [vmem:[%s2037_s28 + $0xd8] sm:$0xff] %v1192_v54  ;;  %1134 = sbr.rel (!%p1131_p9) target bundleno = 335 (0x14f), region = 236 }
 0x16c   : >> { %1195 = vst [vmem:[%s2037_s28 + $0xe0] sm:$0xff] %v1194_v55 }
 0x16d   : >> { %1197 = vst [vmem:[%s2037_s28 + $0xe8] sm:$0xff] %v1196_v56 }
 0x16e   : >> { %1199 = vst [vmem:[%s2037_s28 + $0xf0] sm:$0xff] %v1198_v57 }
 0x16f   : >> { %1201 = vst [vmem:[%s2037_s28 + $0xf8] sm:$0xff] %v1200_v62  ;;  %s2876_s28 = smov %s2633_s11 }
 0x170 PF: > { %s2699_s14 = sand.u32 31, %s1127_s26   ;;  %s1657_s15 = sshll.u32 %s2587_s27, 8 }
 0x171   : > { %s1213_s17 = scalar_lea.vmem %s2280_s12, %s1657_s15 [#allocation3]   ;;  %s1215_s21 = scalar_lea.vmem %s2573_s18, %s1657_s15  }
 0x172   : > { %p1633_p10 = scmp.le.s32.totalorder %s2699_s14, 0 }
 0x173   : > { %s2051_s30 = smov (!%p1633_p10), %s1215_s21   ;;  %s2055_s13 = smov (!%p1633_p10), %s1213_s17  }
 0x174   : > { %1508 = sbr.rel (%p1633_p10) target bundleno = 385 (0x181), region = 241  ;;  %s2059_s10 = smov (!%p1633_p10), 0  }
 0x175   : > { %s2063_s24 = smov (!%p1633_p10), 0  }
 0x179 LB: >> { %v1225_v58 = vld [vmem:[%s2057_s13] sm:$0xff]  ;;  %s1227_s25 = sadd.s32 1, %s2061_s10  ;;  %s1219_s24 = sadd.s32 1, %s2065_s24   ;;  %s2065_s24 = sphi %s2063_s24, %s1219_s24   ;;  %s2061_s10 = sphi %s2059_s10, %s2060_s10   ;;  %s2057_s13 = sphi %s2055_s13, %s1232_s13   ;;  %s2053_s30 = sphi %s2051_s30, %s1233_s30  }
 0x17a   : >> { %1226 = vst [vmem:[%s2053_s30] sm:$0xff] %v1225_v58  ;;  %p1228_p11 = scmp.ge.s32.totalorder %s1227_s25, %s2699_s14  ;;  %p1218_p12 = scmp.ge.s32.totalorder %s1219_s24, %s2699_s14 }
 0x17c   : >> { %s2898_s25 = smov (%p1228_p11, %s1227_s25), 0  ;;  %1221 = sbr.rel (!%p1218_p12) target bundleno = 377 (0x179), region = 247 }
 0x17d   : >> { %s1634_s26 = sshll.u32 %s2898_s25, 3  ;;  %s2060_s10 = smov %s2898_s25  }
 0x17e   : >> { %s1232_s13 = scalar_lea.vmem %s1213_s17, %s1634_s26 [#allocation3]   ;;  %s1233_s30 = scalar_lea.vmem %s1215_s21, %s1634_s26  }
 0x181 PF: > { %1236 = sbr.rel (%p1123_p4) target bundleno = 450 (0x1c2), region = 125  ;;  %s2711_s27 = ssub.s32 (!%p1123_p4), %s2894_s20, %s2580_s23 }
 0x182   : > { %s1242_s28 = sshrl.u32 (!%p1123_p4), %s2894_s20, 3  ;;  %s1239_s29 = scalar_lea.vmem (!%p1123_p4), %s2280_s12, %s2711_s27 [#allocation3] }
 0x183   : > { %s1241_s5 = scalar_lea.vmem (!%p1123_p4), %s2573_s18, %s2711_s27  ;;  %s2720_s6 = sshrl.u32 (!%p1123_p4), %s1242_s28, 5 }
 0x184   : > { %p1636_p13 = scmp.le.s32.totalorder (!%p1123_p4), %s2720_s6, 0 }
 0x186   : > { %1522 = sbr.rel (%p1636_p13) target bundleno = 428 (0x1ac), region = 252  ;;  %s2879_s7 = smov (!%p1636_p13), %s2573_s18 }
 0x187   : > { %s2880_s8 = smov (!%p1636_p13), %s2280_s12  ;;  %s2729_s9 = smov (!%p1636_p13), 0  }
 0x188   : > { %s2731_s11 = smov (!%p1636_p13), 0  }
 0x18b LB: >> { %v1253_v59 = vld [vmem:[%s2073_s8] sm:$0xff]  ;;  %v1255_v60 = vld [vmem:[%s2073_s8 + $0x8] sm:$0xff]  ;;  %v1257_v61 = vld [vmem:[%s2073_s8 + $0x10] sm:$0xff]  ;;  %s1317_s14 = sadd.s32 1, %s2077_s9  ;;  %s1247_s11 = sadd.s32 1, %s2081_s11   ;;  %s2081_s11 = sphi %s2731_s11, %s1247_s11   ;;  %s2077_s9 = sphi %s2729_s9, %s2883_s9   ;;  %s2073_s8 = sphi %s2880_s8, %s2882_s8   ;;  %s2069_s7 = sphi %s2879_s7, %s2881_s7  }
 0x18c   : >> { %1254 = vst [vmem:[%s2069_s7] sm:$0xff] %v1253_v59  ;;  %v1259_v63 = vld [vmem:[%s2073_s8 + $0x18] sm:$0xff]  ;;  %p1318_p0 = scmp.ge.s32.totalorder %s1317_s14, %s2720_s6  ;;  %v1261_v0 = vld [vmem:[%s2073_s8 + $0x20] sm:$0xff]  ;;  %v1263_v1 = vld [vmem:[%s2073_s8 + $0x28] sm:$0xff]  ;;  %p1246_p1 = scmp.ge.s32.totalorder %s1247_s11, %s2720_s6 }
 0x18d   : >> { %1256 = vst [vmem:[%s2069_s7 + $0x8] sm:$0xff] %v1255_v60  ;;  %v1265_v2 = vld [vmem:[%s2073_s8 + $0x30] sm:$0xff]  ;;  %v1267_v3 = vld [vmem:[%s2073_s8 + $0x38] sm:$0xff]  ;;  %v1269_v4 = vld [vmem:[%s2073_s8 + $0x40] sm:$0xff] }
 0x18e   : >> { %1258 = vst [vmem:[%s2069_s7 + $0x10] sm:$0xff] %v1257_v61  ;;  %s2900_s14 = smov (%p1318_p0, %s1317_s14), 0  ;;  %v1271_v6 = vld [vmem:[%s2073_s8 + $0x48] sm:$0xff]  ;;  %v1273_v7 = vld [vmem:[%s2073_s8 + $0x50] sm:$0xff]  ;;  %v1275_v8 = vld [vmem:[%s2073_s8 + $0x58] sm:$0xff] }
 0x18f   : >> { %1260 = vst [vmem:[%s2069_s7 + $0x18] sm:$0xff] %v1259_v63  ;;  %s1637_s15 = sshll.u32 %s2900_s14, 8  ;;  %v1277_v5 = vld [vmem:[%s2073_s8 + $0x60] sm:$0xff]  ;;  %v1279_v9 = vld [vmem:[%s2073_s8 + $0x68] sm:$0xff]  ;;  %v1281_v10 = vld [vmem:[%s2073_s8 + $0x70] sm:$0xff]  ;;  %s2883_s9 = smov %s2900_s14 }
 0x190   : >> { %1262 = vst [vmem:[%s2069_s7 + $0x20] sm:$0xff] %v1261_v0  ;;  %s2763_s17 = scalar_lea.vmem %s2280_s12, %s1637_s15 [#allocation3]   ;;  %s2766_s21 = scalar_lea.vmem %s2573_s18, %s1637_s15   ;;  %v1283_v11 = vld [vmem:[%s2073_s8 + $0x78] sm:$0xff]  ;;  %v1285_v12 = vld [vmem:[%s2073_s8 + $0x80] sm:$0xff]  ;;  %v1287_v49 = vld [vmem:[%s2073_s8 + $0x88] sm:$0xff] }
 0x191   : >> { %1264 = vst [vmem:[%s2069_s7 + $0x28] sm:$0xff] %v1263_v1  ;;  %v1289_v13 = vld [vmem:[%s2073_s8 + $0x90] sm:$0xff]  ;;  %v1291_v14 = vld [vmem:[%s2073_s8 + $0x98] sm:$0xff]  ;;  %v1293_v15 = vld [vmem:[%s2073_s8 + $0xa0] sm:$0xff] }
 0x192   : >> { %1266 = vst [vmem:[%s2069_s7 + $0x30] sm:$0xff] %v1265_v2  ;;  %v1295_v16 = vld [vmem:[%s2073_s8 + $0xa8] sm:$0xff]  ;;  %v1297_v17 = vld [vmem:[%s2073_s8 + $0xb0] sm:$0xff]  ;;  %v1299_v18 = vld [vmem:[%s2073_s8 + $0xb8] sm:$0xff] }
 0x193   : >> { %1268 = vst [vmem:[%s2069_s7 + $0x38] sm:$0xff] %v1267_v3  ;;  %v1301_v19 = vld [vmem:[%s2073_s8 + $0xc0] sm:$0xff]  ;;  %v1303_v20 = vld [vmem:[%s2073_s8 + $0xc8] sm:$0xff]  ;;  %v1305_v21 = vld [vmem:[%s2073_s8 + $0xd0] sm:$0xff] }
 0x194   : >> { %1270 = vst [vmem:[%s2069_s7 + $0x40] sm:$0xff] %v1269_v4  ;;  %v1307_v22 = vld [vmem:[%s2073_s8 + $0xd8] sm:$0xff]  ;;  %v1309_v23 = vld [vmem:[%s2073_s8 + $0xe0] sm:$0xff]  ;;  %v1311_v24 = vld [vmem:[%s2073_s8 + $0xe8] sm:$0xff] }
 0x195   : >> { %1272 = vst [vmem:[%s2069_s7 + $0x48] sm:$0xff] %v1271_v6  ;;  %v1313_v25 = vld [vmem:[%s2073_s8 + $0xf0] sm:$0xff]  ;;  %v1315_v26 = vld [vmem:[%s2073_s8 + $0xf8] sm:$0xff]  ;;  %s2882_s8 = smov %s2763_s17 }
 0x196   : >> { %1274 = vst [vmem:[%s2069_s7 + $0x50] sm:$0xff] %v1273_v7 }
 0x197   : >> { %1276 = vst [vmem:[%s2069_s7 + $0x58] sm:$0xff] %v1275_v8 }
 0x198   : >> { %1278 = vst [vmem:[%s2069_s7 + $0x60] sm:$0xff] %v1277_v5 }
 0x199   : >> { %1280 = vst [vmem:[%s2069_s7 + $0x68] sm:$0xff] %v1279_v9 }
 0x19a   : >> { %1282 = vst [vmem:[%s2069_s7 + $0x70] sm:$0xff] %v1281_v10 }
 0x19b   : >> { %1284 = vst [vmem:[%s2069_s7 + $0x78] sm:$0xff] %v1283_v11 }
 0x19c   : >> { %1286 = vst [vmem:[%s2069_s7 + $0x80] sm:$0xff] %v1285_v12 }
 0x19d   : >> { %1288 = vst [vmem:[%s2069_s7 + $0x88] sm:$0xff] %v1287_v49 }
 0x19e   : >> { %1290 = vst [vmem:[%s2069_s7 + $0x90] sm:$0xff] %v1289_v13 }
 0x19f   : >> { %1292 = vst [vmem:[%s2069_s7 + $0x98] sm:$0xff] %v1291_v14 }
 0x1a0   : >> { %1294 = vst [vmem:[%s2069_s7 + $0xa0] sm:$0xff] %v1293_v15 }
 0x1a1   : >> { %1296 = vst [vmem:[%s2069_s7 + $0xa8] sm:$0xff] %v1295_v16 }
 0x1a2   : >> { %1298 = vst [vmem:[%s2069_s7 + $0xb0] sm:$0xff] %v1297_v17 }
 0x1a3   : >> { %1300 = vst [vmem:[%s2069_s7 + $0xb8] sm:$0xff] %v1299_v18 }
 0x1a4   : >> { %1302 = vst [vmem:[%s2069_s7 + $0xc0] sm:$0xff] %v1301_v19 }
 0x1a5   : >> { %1304 = vst [vmem:[%s2069_s7 + $0xc8] sm:$0xff] %v1303_v20 }
 0x1a6   : >> { %1306 = vst [vmem:[%s2069_s7 + $0xd0] sm:$0xff] %v1305_v21 }
 0x1a7   : >> { %1308 = vst [vmem:[%s2069_s7 + $0xd8] sm:$0xff] %v1307_v22  ;;  %1249 = sbr.rel (!%p1246_p1) target bundleno = 395 (0x18b), region = 258 }
 0x1a8   : >> { %1310 = vst [vmem:[%s2069_s7 + $0xe0] sm:$0xff] %v1309_v23 }
 0x1a9   : >> { %1312 = vst [vmem:[%s2069_s7 + $0xe8] sm:$0xff] %v1311_v24 }
 0x1aa   : >> { %1314 = vst [vmem:[%s2069_s7 + $0xf0] sm:$0xff] %v1313_v25 }
 0x1ab   : >> { %1316 = vst [vmem:[%s2069_s7 + $0xf8] sm:$0xff] %v1315_v26  ;;  %s2881_s7 = smov %s2766_s21 }
 0x1ac PF: > { %s2832_s30 = sand.u32 31, %s1242_s28   ;;  %s1659_s13 = sshll.u32 %s2720_s6, 8 }
 0x1ad   : > { %s1328_s10 = scalar_lea.vmem %s2280_s12, %s1659_s13 [#allocation3]   ;;  %s1330_s24 = scalar_lea.vmem %s2573_s18, %s1659_s13  }
 0x1ae   : > { %p1642_p2 = scmp.le.s32.totalorder %s2832_s30, 0 }
 0x1af   : > { %s2083_s25 = smov (!%p1642_p2), %s1330_s24   ;;  %s2087_s26 = smov (!%p1642_p2), %s1328_s10  }
 0x1b0   : > { %1536 = sbr.rel (%p1642_p2) target bundleno = 445 (0x1bd), region = 263  ;;  %s2091_s14 = smov (!%p1642_p2), 0  }
 0x1b1   : > { %s2095_s15 = smov (!%p1642_p2), 0  }
 0x1b5 LB: >> { %v1340_v27 = vld [vmem:[%s2089_s26] sm:$0xff]  ;;  %s1342_s28 = sadd.s32 1, %s2093_s14  ;;  %s1334_s15 = sadd.s32 1, %s2097_s15   ;;  %s2097_s15 = sphi %s2095_s15, %s1334_s15   ;;  %s2093_s14 = sphi %s2091_s14, %s2092_s14   ;;  %s2089_s26 = sphi %s2087_s26, %s1347_s26   ;;  %s2085_s25 = sphi %s2083_s25, %s1348_s25  }
 0x1b6   : >> { %1341 = vst [vmem:[%s2085_s25] sm:$0xff] %v1340_v27  ;;  %p1343_p3 = scmp.ge.s32.totalorder %s1342_s28, %s2832_s30  ;;  %p1333_p5 = scmp.ge.s32.totalorder %s1334_s15, %s2832_s30 }
 0x1b8   : >> { %s2902_s28 = smov (%p1343_p3, %s1342_s28), 0  ;;  %1336 = sbr.rel (!%p1333_p5) target bundleno = 437 (0x1b5), region = 269 }
 0x1b9   : >> { %s1643_s6 = sshll.u32 %s2902_s28, 3  ;;  %s2092_s14 = smov %s2902_s28  }
 0x1ba   : >> { %s1347_s26 = scalar_lea.vmem %s1328_s10, %s1643_s6 [#allocation3]   ;;  %s1348_s25 = scalar_lea.vmem %s1330_s24, %s1643_s6  }
 0x1bd PF: > { %s2099_s7 = smov 1  }
 0x1be   : > { %s1349_s8 = sshll.u32 %s2099_s7, %s2580_s23 }
 0x1bf   : > { %s1645_s9 = sadd.s32 4294967295, %s1349_s8 }
 0x1c0   : > { %v1359_v28 = vld [vmem:[%s1239_s29] sm:%s1645_s9] }
 0x1c1   : > { %1360 = vst [vmem:[%s1241_s5] sm:%s1645_s9] %v1359_v28 }
 0x1c2 PF: > { %p1646_p4 = scmp.ge.u32.totalorder %s2894_s20, 8 }
 0x1c3   : > { %s2100_s11 = smov (!%p1646_p4), 1  }
 0x1c4   : > { %1109 = sbr.rel (%p1646_p4) target bundleno = 459 (0x1cb), region = 96  ;;  %s1110_s17 = sshll.u32 (!%p1646_p4), %s2100_s11, %s2894_s20 }
 0x1c5   : > { %s1647_s21 = sadd.s32 (!%p1646_p4), 4294967295, %s1110_s17 }
 0x1c9   : > { %v1120_v29 = vld [vmem:[%s2280_s12] sm:%s1647_s21] }
 0x1ca   : > { %1121 = vst [vmem:[%s2573_s18] sm:%s1647_s21] %v1120_v29 }
 0x1cb PF: > { %p12_p6 = scmp.ge.s32.totalorder %s2141_s19, 15   ;;  %s2884_s15 = smov %s1997_s16 }
 0x1cc   : > { %s2885_s16 = smov %s2149_s22  ;;  %s2886_s17 = smov %s2141_s19 }
 0x1cd   :  { %14 = sbr.rel (!%p12_p6) target bundleno = 2 (0x2), region = 280 }

</bundles_post_ra>
